<compile_context>
chip_gen: v5e
topology: v5e:2x2
jax: 0.10.0
libtpu: 0.0.40
codegen_flags: <defaults>
</compile_context>

<pallas_src>
import functools
import math

import jax
import jax.numpy as jnp
import numpy as np
from jax.experimental import pallas as pl
from jax.experimental.pallas import tpu as pltpu

EPS = 1e-8


# ----------------------------------------------------------------------------
# Host-side (trace-time) constants: PyTorch-style bilinear weights + packing.
# ----------------------------------------------------------------------------
def bilinear_weight_matrix(out_size: int, in_size: int) -> np.ndarray:
    """W such that W @ grid @ W.T == F.interpolate(grid, mode='bilinear',
    align_corners=False) (separable 1-D weights, torch semantics)."""
    scale = in_size / out_size
    dst = np.arange(out_size, dtype=np.float64)
    src = (dst + 0.5) * scale - 0.5
    src = np.clip(src, 0.0, None)                 # torch clamps negative coords
    i0 = np.clip(np.floor(src).astype(np.int64), 0, in_size - 1)
    i1 = np.minimum(i0 + 1, in_size - 1)
    lam1 = src - i0
    lam0 = 1.0 - lam1
    w = np.zeros((out_size, in_size), dtype=np.float32)
    rows = np.arange(out_size)
    np.add.at(w, (rows, i0), lam0)
    np.add.at(w, (rows, i1), lam1)
    return w


def _pack_factors(w: np.ndarray, g: int, length: int):
    """Fold 'scatter v (len L) row-major into a zero-padded g x g grid, then
    W @ G @ W^T' into two [S, L] factors, so that out = (U * v_row) @ V^T."""
    idx = np.arange(length)
    a = np.zeros((g, length), np.float32)         # A[r, i] = [i // g == r]
    a[idx // g, idx] = 1.0
    b = np.zeros((g, length), np.float32)         # B[c, i] = [i %  g == c]
    b[idx % g, idx] = 1.0
    return (w @ a).astype(np.float32), (w @ b).astype(np.float32)


@functools.lru_cache(maxsize=None)
def _encoder_constants(image_size: int, emb_dim: int, num_nodes: int):
    s = image_size
    g_t = int(math.ceil(math.sqrt(emb_dim)))
    g_s = int(math.ceil(math.sqrt(num_nodes)))
    u_t, v_t = _pack_factors(bilinear_weight_matrix(s, g_t), g_t, emb_dim)
    u_s, v_s = _pack_factors(bilinear_weight_matrix(s, g_s), g_s, num_nodes)
    w_c = bilinear_weight_matrix(s, emb_dim)      # [S, E]
    return u_t, v_t, u_s, v_s, w_c


# ----------------------------------------------------------------------------
# Fused kernel: stats -> three perspective maps -> global min-max, all in VMEM.
# ----------------------------------------------------------------------------
def _fused_encoder_kernel(x_ref, ut_ref, vt_ref, us_ref, vs_ref, wc_ref, o_ref):
    f32 = jnp.float32
    batch = x_ref.shape[0]
    n = x_ref.shape[2]
    u_t, v_t = ut_ref[...], vt_ref[...]           # [S, E]
    u_s, v_s = us_ref[...], vs_ref[...]           # [S, N]
    w_c = wc_ref[...]                             # [S, E]
    mean_n_row = jnp.full((1, n), 1.0 / n, f32)   # row-mean weights (MXU matvec)

    mins = [[] for _ in range(3)]
    maxs = [[] for _ in range(3)]

    # Pass 1: raw perspective maps -> output block (stays in VMEM), collecting
    # per-(batch, perspective) min / max as (1,1) values.
    for b in range(batch):
        xb = x_ref[b]                                                   # [E, N]

        # temporal view: mean over nodes.  We need it in ROW layout ([1, E]) to
        # scale the lanes of u_t, so it is computed as a 1xN matvec on the MXU
        # rather than an XLU column-reduce followed by a sublane->lane relayout.
        ts_row = jax.lax.dot_general(mean_n_row, xb,
                                     (((1,), (1,)), ((), ())),
                                     preferred_element_type=f32)        # [1, E]
        temporal = jax.lax.dot_general(u_t * ts_row, v_t,
                                       (((1,), (1,)), ((), ())),
                                       preferred_element_type=f32)      # [S, S]

        # spatial view: mean over emb_dim is naturally a row ([1, N]).
        nf_row = jnp.mean(xb, axis=0, keepdims=True)                    # [1, N]
        spatial = jax.lax.dot_general(u_s * nf_row, v_s,
                                      (((1,), (1,)), ((), ())),
                                      preferred_element_type=f32)       # [S, S]

        # correlation view: W_c (xn xn^T) W_c^T == (W_c xn)(W_c xn)^T.
        mu = jnp.mean(xb, axis=1, keepdims=True)                        # [E, 1]
        xc = xb - mu
        nrm = jnp.sqrt(jnp.sum(xc * xc, axis=1, keepdims=True)) + EPS
        xn = xc / nrm
        y = jnp.dot(w_c, xn, preferred_element_type=f32)                # [S, N]
        corr = jax.lax.dot_general(y, y, (((1,), (1,)), ((), ())),
                                   preferred_element_type=f32)          # [S, S]

        for p, m in enumerate((temporal, spatial, corr)):
            o_ref[b, p] = m
            mins[p].append(jnp.min(m, keepdims=True))                   # (1, 1)
            maxs[p].append(jnp.max(m, keepdims=True))                   # (1, 1)

    # Pass 2: global (over batch + spatial) min-max normalization with torch
    # semantics: zeros if the range is degenerate, else (x - mn) / (rng + eps).
    # One reciprocal per perspective, then a plain VPU multiply over the maps.
    for p in range(3):
        mn = functools.reduce(jnp.minimum, mins[p])                     # (1, 1)
        mx = functools.reduce(jnp.maximum, maxs[p])                     # (1, 1)
        rng = mx - mn
        inv = pl.reciprocal(rng + EPS, approx=False)
        inv = jnp.where(rng < EPS, jnp.zeros_like(inv), inv)            # -> zeros
        for b in range(batch):
            v = o_ref[b, p]
            o_ref[b, p] = (v - mn) * inv


# ----------------------------------------------------------------------------
# Wrapper: full MultiPerspectiveVisualEncoder.forward (single pallas_call)
# ----------------------------------------------------------------------------
@functools.partial(jax.jit, static_argnames=("image_size",))
def multi_perspective_visual_encoder(hidden_state, image_size=64):
    """hidden_state: [B, emb_dim, N, 1] -> [B, 3, image_size, image_size] f32."""
    x = hidden_state[..., 0].astype(jnp.float32)          # [B, E, N]
    b, e, n = x.shape
    s = image_size
    consts = [jnp.asarray(c) for c in _encoder_constants(s, e, n)]

    out = pl.pallas_call(
        _fused_encoder_kernel,
        out_shape=jax.ShapeDtypeStruct((b, 3, s, s), jnp.float32),
        grid=(1,),
        in_specs=[
            pl.BlockSpec((b, e, n), lambda i: (0, 0, 0)),   # x
            pl.BlockSpec((s, e), lambda i: (0, 0)),         # U_t
            pl.BlockSpec((s, e), lambda i: (0, 0)),         # V_t
            pl.BlockSpec((s, n), lambda i: (0, 0)),         # U_s
            pl.BlockSpec((s, n), lambda i: (0, 0)),         # V_s
            pl.BlockSpec((s, e), lambda i: (0, 0)),         # W_c
        ],
        out_specs=pl.BlockSpec((b, 3, s, s), lambda i: (0, 0, 0, 0)),
        compiler_params=pltpu.CompilerParams(
            dimension_semantics=("arbitrary",)),
    )(x, *consts)
    # TODO(synk): save_visualization (PIL PNG writing) is host file I/O; omitted.
    return out


# ----------------------------------------------------------------------------
# Pure-jnp reference (unfused math: explicit grid packing + W @ G @ W^T) for
# an independent correctness check of the host-side folding.
# ----------------------------------------------------------------------------
def reference_forward(hidden_state, image_size=64):
    x = hidden_state[..., 0].astype(jnp.float32)
    B, E, N = x.shape
    S = image_size
    g_t = int(math.ceil(math.sqrt(E)))
    g_s = int(math.ceil(math.sqrt(N)))
    w_t = jnp.asarray(bilinear_weight_matrix(S, g_t))
    w_s = jnp.asarray(bilinear_weight_matrix(S, g_s))
    w_c = jnp.asarray(bilinear_weight_matrix(S, E))

    ts = x.mean(axis=2)                                        # [B, E]
    nf = x.mean(axis=1)                                        # [B, N]
    t_grid = jnp.zeros((B, g_t * g_t)).at[:, :E].set(ts).reshape(B, g_t, g_t)
    s_grid = jnp.zeros((B, g_s * g_s)).at[:, :N].set(nf).reshape(B, g_s, g_s)

    mu = x.mean(axis=2, keepdims=True)
    xc = x - mu
    nrm = jnp.sqrt(jnp.sum(xc * xc, axis=2, keepdims=True)) + EPS
    xn = xc / nrm
    corr = jnp.einsum("ben,bfn->bef", xn, xn)

    def up(g, w):
        return jnp.einsum("sp,bpq,tq->bst", w, g, w)

    def nrmz(v):
        mn, mx = v.min(), v.max()
        r = mx - mn
        return jnp.where(r < EPS, jnp.zeros_like(v), (v - mn) / (r + EPS))

    return jnp.stack(
        [nrmz(up(t_grid, w_t)), nrmz(up(s_grid, w_s)), nrmz(up(corr, w_c))], axis=1
    )


if __name__ == "__main__":
    key = jax.random.PRNGKey(0)
    B, E, N = 2, 32, 16
    image_size = 64
    hidden_state = jax.random.normal(key, (B, E, N, 1), dtype=jnp.float32)

    out = multi_perspective_visual_encoder(hidden_state, image_size=image_size)
    out = jax.block_until_ready(out)

    ref = reference_forward(hidden_state, image_size=image_size)
    assert out.shape == (B, 3, image_size, image_size), out.shape
    assert bool(jnp.all(jnp.isfinite(out)))
    err = float(jnp.max(jnp.abs(out - ref)))
    assert err < 1e-4, err
    print("KERNEL_OK")
</pallas_src>

<mosaic_0001>
module attributes {stable_mosaic.version = 11 : i64} {
  func.func @_fused_encoder_kernel(%arg0: i32, %arg1: memref<2x32x16xf32, #tpu.memory_space<vmem>>, %arg2: memref<64x32xf32, #tpu.memory_space<vmem>>, %arg3: memref<64x32xf32, #tpu.memory_space<vmem>>, %arg4: memref<64x16xf32, #tpu.memory_space<vmem>>, %arg5: memref<64x16xf32, #tpu.memory_space<vmem>>, %arg6: memref<64x32xf32, #tpu.memory_space<vmem>>, %arg7: memref<2x3x64x64xf32, #tpu.memory_space<vmem>>) attributes {dimension_semantics = [#tpu.dimension_semantics<arbitrary>], iteration_bounds = array<i64: 1>, scalar_prefetch = 0 : i64, scratch_operands = 0 : i64, tpu.core_type = #tpu.core_type<tc>, window_params = [{pipeline_mode = #tpu.pipeline_mode<synchronous>, transform_indices = @transform_0, window_bounds = array<i64: 2, 32, 16>}, {pipeline_mode = #tpu.pipeline_mode<synchronous>, transform_indices = @transform_1, window_bounds = array<i64: 64, 32>}, {pipeline_mode = #tpu.pipeline_mode<synchronous>, transform_indices = @transform_2, window_bounds = array<i64: 64, 32>}, {pipeline_mode = #tpu.pipeline_mode<synchronous>, transform_indices = @transform_3, window_bounds = array<i64: 64, 16>}, {pipeline_mode = #tpu.pipeline_mode<synchronous>, transform_indices = @transform_4, window_bounds = array<i64: 64, 16>}, {pipeline_mode = #tpu.pipeline_mode<synchronous>, transform_indices = @transform_5, window_bounds = array<i64: 64, 32>}, {pipeline_mode = #tpu.pipeline_mode<synchronous>, transform_indices = @transform_6, window_bounds = array<i64: 2, 3, 64, 64>}]} {
    %c0 = arith.constant 0 : index
    %c0_0 = arith.constant 0 : index
    %0 = vector.load %arg2[%c0, %c0_0] : memref<64x32xf32, #tpu.memory_space<vmem>>, vector<64x32xf32>
    %c0_1 = arith.constant 0 : index
    %c0_2 = arith.constant 0 : index
    %1 = vector.load %arg3[%c0_1, %c0_2] : memref<64x32xf32, #tpu.memory_space<vmem>>, vector<64x32xf32>
    %c0_3 = arith.constant 0 : index
    %c0_4 = arith.constant 0 : index
    %2 = vector.load %arg4[%c0_3, %c0_4] : memref<64x16xf32, #tpu.memory_space<vmem>>, vector<64x16xf32>
    %c0_5 = arith.constant 0 : index
    %c0_6 = arith.constant 0 : index
    %3 = vector.load %arg5[%c0_5, %c0_6] : memref<64x16xf32, #tpu.memory_space<vmem>>, vector<64x16xf32>
    %c0_7 = arith.constant 0 : index
    %c0_8 = arith.constant 0 : index
    %4 = vector.load %arg6[%c0_7, %c0_8] : memref<64x32xf32, #tpu.memory_space<vmem>>, vector<64x32xf32>
    %cst = arith.constant 6.250000e-02 : f32
    %5 = vector.broadcast %cst : f32 to vector<1x16xf32>
    %c0_9 = arith.constant 0 : index
    %c0_10 = arith.constant 0 : index
    %c0_11 = arith.constant 0 : index
    %6 = vector.load %arg1[%c0_9, %c0_10, %c0_11] : memref<2x32x16xf32, #tpu.memory_space<vmem>>, vector<1x32x16xf32>
    %7 = vector.shape_cast %6 : vector<1x32x16xf32> to vector<32x16xf32>
    %cst_12 = arith.constant dense<0.000000e+00> : vector<1x32xf32>
    %8 = tpu.matmul %5, %7, %cst_12 {dimension_numbers = #tpu.dot_dimension_numbers<[1], [1], [0], [0], [0, 0, 1, 0], [], []>} : vector<1x16xf32>, vector<32x16xf32>, vector<1x32xf32> -> vector<1x32xf32>
    %9 = vector.broadcast %8 : vector<1x32xf32> to vector<64x32xf32>
    %10 = arith.mulf %0, %9 : vector<64x32xf32>
    %cst_13 = arith.constant dense<0.000000e+00> : vector<64x64xf32>
    %11 = tpu.matmul %10, %1, %cst_13 {dimension_numbers = #tpu.dot_dimension_numbers<[1], [1], [0], [0], [0, 0, 1, 0], [], []>} : vector<64x32xf32>, vector<64x32xf32>, vector<64x64xf32> -> vector<64x64xf32>
    %cst_14 = arith.constant dense<0.000000e+00> : vector<16xf32>
    %12 = vector.multi_reduction <add>, %7, %cst_14 [0] : vector<32x16xf32> to vector<16xf32>
    %13 = vector.shape_cast %12 : vector<16xf32> to vector<1x16xf32>
    %cst_15 = arith.constant 3.200000e+01 : f32
    %14 = vector.broadcast %cst_15 : f32 to vector<1x16xf32>
    %15 = arith.divf %13, %14 : vector<1x16xf32>
    %16 = vector.broadcast %15 : vector<1x16xf32> to vector<64x16xf32>
    %17 = arith.mulf %2, %16 : vector<64x16xf32>
    %cst_16 = arith.constant dense<0.000000e+00> : vector<64x64xf32>
    %18 = tpu.matmul %17, %3, %cst_16 {dimension_numbers = #tpu.dot_dimension_numbers<[1], [1], [0], [0], [0, 0, 1, 0], [], []>} : vector<64x16xf32>, vector<64x16xf32>, vector<64x64xf32> -> vector<64x64xf32>
    %cst_17 = arith.constant dense<0.000000e+00> : vector<32xf32>
    %19 = vector.multi_reduction <add>, %7, %cst_17 [1] : vector<32x16xf32> to vector<32xf32>
    %20 = vector.shape_cast %19 : vector<32xf32> to vector<32x1xf32>
    %cst_18 = arith.constant 1.600000e+01 : f32
    %21 = vector.broadcast %cst_18 : f32 to vector<32x1xf32>
    %22 = arith.divf %20, %21 : vector<32x1xf32>
    %23 = vector.broadcast %22 : vector<32x1xf32> to vector<32x16xf32>
    %24 = arith.subf %7, %23 : vector<32x16xf32>
    %25 = arith.mulf %24, %24 : vector<32x16xf32>
    %cst_19 = arith.constant dense<0.000000e+00> : vector<32xf32>
    %26 = vector.multi_reduction <add>, %25, %cst_19 [1] : vector<32x16xf32> to vector<32xf32>
    %27 = vector.shape_cast %26 : vector<32xf32> to vector<32x1xf32>
    %28 = math.sqrt %27 : vector<32x1xf32>
    %cst_20 = arith.constant 9.99999993E-9 : f32
    %29 = vector.broadcast %cst_20 : f32 to vector<32x1xf32>
    %30 = arith.addf %28, %29 : vector<32x1xf32>
    %31 = vector.broadcast %30 : vector<32x1xf32> to vector<32x16xf32>
    %32 = arith.divf %24, %31 : vector<32x16xf32>
    %cst_21 = arith.constant dense<0.000000e+00> : vector<64x16xf32>
    %33 = tpu.matmul %4, %32, %cst_21 {dimension_numbers = #tpu.dot_dimension_numbers<[1], [0], [0], [1], [0, 0, 1, 1], [], []>} : vector<64x32xf32>, vector<32x16xf32>, vector<64x16xf32> -> vector<64x16xf32>
    %cst_22 = arith.constant dense<0.000000e+00> : vector<64x64xf32>
    %34 = tpu.matmul %33, %33, %cst_22 {dimension_numbers = #tpu.dot_dimension_numbers<[1], [1], [0], [0], [0, 0, 1, 0], [], []>} : vector<64x16xf32>, vector<64x16xf32>, vector<64x64xf32> -> vector<64x64xf32>
    %c0_23 = arith.constant 0 : index
    %c0_24 = arith.constant 0 : index
    %c0_25 = arith.constant 0 : index
    %c0_26 = arith.constant 0 : index
    %35 = vector.load %arg7[%c0_23, %c0_24, %c0_25, %c0_26] : memref<2x3x64x64xf32, #tpu.memory_space<vmem>>, vector<1x1x64x64xf32>
    %36 = vector.shape_cast %35 : vector<1x1x64x64xf32> to vector<64x64xf32>
    %37 = vector.shape_cast %11 : vector<64x64xf32> to vector<1x1x64x64xf32>
    tpu.vector_store %arg7[%c0_23, %c0_24, %c0_25, %c0_26], %37 {strides = array<i32>} : memref<2x3x64x64xf32, #tpu.memory_space<vmem>>, vector<1x1x64x64xf32>,
    %38 = vector.shape_cast %11 : vector<64x64xf32> to vector<1x64x64xf32>
    %cst_27 = arith.constant dense<0x7F800000> : vector<1xf32>
    %39 = vector.multi_reduction <minimumf>, %38, %cst_27 [1, 2] : vector<1x64x64xf32> to vector<1xf32>
    %40 = vector.shape_cast %39 : vector<1xf32> to vector<1x1x1xf32>
    %41 = vector.extract %40[0, 0, 0] : f32 from vector<1x1x1xf32>
    %42 = vector.broadcast %41 : f32 to vector<1x1xf32>
    %43 = vector.shape_cast %11 : vector<64x64xf32> to vector<1x64x64xf32>
    %cst_28 = arith.constant dense<0xFF800000> : vector<1xf32>
    %44 = vector.multi_reduction <maximumf>, %43, %cst_28 [1, 2] : vector<1x64x64xf32> to vector<1xf32>
    %45 = vector.shape_cast %44 : vector<1xf32> to vector<1x1x1xf32>
    %46 = vector.extract %45[0, 0, 0] : f32 from vector<1x1x1xf32>
    %47 = vector.broadcast %46 : f32 to vector<1x1xf32>
    %c0_29 = arith.constant 0 : index
    %c1 = arith.constant 1 : index
    %c0_30 = arith.constant 0 : index
    %c0_31 = arith.constant 0 : index
    %48 = vector.load %arg7[%c0_29, %c1, %c0_30, %c0_31] : memref<2x3x64x64xf32, #tpu.memory_space<vmem>>, vector<1x1x64x64xf32>
    %49 = vector.shape_cast %48 : vector<1x1x64x64xf32> to vector<64x64xf32>
    %50 = vector.shape_cast %18 : vector<64x64xf32> to vector<1x1x64x64xf32>
    tpu.vector_store %arg7[%c0_29, %c1, %c0_30, %c0_31], %50 {strides = array<i32>} : memref<2x3x64x64xf32, #tpu.memory_space<vmem>>, vector<1x1x64x64xf32>,
    %51 = vector.shape_cast %18 : vector<64x64xf32> to vector<1x64x64xf32>
    %cst_32 = arith.constant dense<0x7F800000> : vector<1xf32>
    %52 = vector.multi_reduction <minimumf>, %51, %cst_32 [1, 2] : vector<1x64x64xf32> to vector<1xf32>
    %53 = vector.shape_cast %52 : vector<1xf32> to vector<1x1x1xf32>
    %54 = vector.extract %53[0, 0, 0] : f32 from vector<1x1x1xf32>
    %55 = vector.broadcast %54 : f32 to vector<1x1xf32>
    %56 = vector.shape_cast %18 : vector<64x64xf32> to vector<1x64x64xf32>
    %cst_33 = arith.constant dense<0xFF800000> : vector<1xf32>
    %57 = vector.multi_reduction <maximumf>, %56, %cst_33 [1, 2] : vector<1x64x64xf32> to vector<1xf32>
    %58 = vector.shape_cast %57 : vector<1xf32> to vector<1x1x1xf32>
    %59 = vector.extract %58[0, 0, 0] : f32 from vector<1x1x1xf32>
    %60 = vector.broadcast %59 : f32 to vector<1x1xf32>
    %c0_34 = arith.constant 0 : index
    %c2 = arith.constant 2 : index
    %c0_35 = arith.constant 0 : index
    %c0_36 = arith.constant 0 : index
    %61 = vector.load %arg7[%c0_34, %c2, %c0_35, %c0_36] : memref<2x3x64x64xf32, #tpu.memory_space<vmem>>, vector<1x1x64x64xf32>
    %62 = vector.shape_cast %61 : vector<1x1x64x64xf32> to vector<64x64xf32>
    %63 = vector.shape_cast %34 : vector<64x64xf32> to vector<1x1x64x64xf32>
    tpu.vector_store %arg7[%c0_34, %c2, %c0_35, %c0_36], %63 {strides = array<i32>} : memref<2x3x64x64xf32, #tpu.memory_space<vmem>>, vector<1x1x64x64xf32>,
    %64 = vector.shape_cast %34 : vector<64x64xf32> to vector<1x64x64xf32>
    %cst_37 = arith.constant dense<0x7F800000> : vector<1xf32>
    %65 = vector.multi_reduction <minimumf>, %64, %cst_37 [1, 2] : vector<1x64x64xf32> to vector<1xf32>
    %66 = vector.shape_cast %65 : vector<1xf32> to vector<1x1x1xf32>
    %67 = vector.extract %66[0, 0, 0] : f32 from vector<1x1x1xf32>
    %68 = vector.broadcast %67 : f32 to vector<1x1xf32>
    %69 = vector.shape_cast %34 : vector<64x64xf32> to vector<1x64x64xf32>
    %cst_38 = arith.constant dense<0xFF800000> : vector<1xf32>
    %70 = vector.multi_reduction <maximumf>, %69, %cst_38 [1, 2] : vector<1x64x64xf32> to vector<1xf32>
    %71 = vector.shape_cast %70 : vector<1xf32> to vector<1x1x1xf32>
    %72 = vector.extract %71[0, 0, 0] : f32 from vector<1x1x1xf32>
    %73 = vector.broadcast %72 : f32 to vector<1x1xf32>
    %c1_39 = arith.constant 1 : index
    %c0_40 = arith.constant 0 : index
    %c0_41 = arith.constant 0 : index
    %74 = vector.load %arg1[%c1_39, %c0_40, %c0_41] : memref<2x32x16xf32, #tpu.memory_space<vmem>>, vector<1x32x16xf32>
    %75 = vector.shape_cast %74 : vector<1x32x16xf32> to vector<32x16xf32>
    %cst_42 = arith.constant dense<0.000000e+00> : vector<1x32xf32>
    %76 = tpu.matmul %5, %75, %cst_42 {dimension_numbers = #tpu.dot_dimension_numbers<[1], [1], [0], [0], [0, 0, 1, 0], [], []>} : vector<1x16xf32>, vector<32x16xf32>, vector<1x32xf32> -> vector<1x32xf32>
    %77 = vector.broadcast %76 : vector<1x32xf32> to vector<64x32xf32>
    %78 = arith.mulf %0, %77 : vector<64x32xf32>
    %cst_43 = arith.constant dense<0.000000e+00> : vector<64x64xf32>
    %79 = tpu.matmul %78, %1, %cst_43 {dimension_numbers = #tpu.dot_dimension_numbers<[1], [1], [0], [0], [0, 0, 1, 0], [], []>} : vector<64x32xf32>, vector<64x32xf32>, vector<64x64xf32> -> vector<64x64xf32>
    %cst_44 = arith.constant dense<0.000000e+00> : vector<16xf32>
    %80 = vector.multi_reduction <add>, %75, %cst_44 [0] : vector<32x16xf32> to vector<16xf32>
    %81 = vector.shape_cast %80 : vector<16xf32> to vector<1x16xf32>
    %cst_45 = arith.constant 3.200000e+01 : f32
    %82 = vector.broadcast %cst_45 : f32 to vector<1x16xf32>
    %83 = arith.divf %81, %82 : vector<1x16xf32>
    %84 = vector.broadcast %83 : vector<1x16xf32> to vector<64x16xf32>
    %85 = arith.mulf %2, %84 : vector<64x16xf32>
    %cst_46 = arith.constant dense<0.000000e+00> : vector<64x64xf32>
    %86 = tpu.matmul %85, %3, %cst_46 {dimension_numbers = #tpu.dot_dimension_numbers<[1], [1], [0], [0], [0, 0, 1, 0], [], []>} : vector<64x16xf32>, vector<64x16xf32>, vector<64x64xf32> -> vector<64x64xf32>
    %cst_47 = arith.constant dense<0.000000e+00> : vector<32xf32>
    %87 = vector.multi_reduction <add>, %75, %cst_47 [1] : vector<32x16xf32> to vector<32xf32>
    %88 = vector.shape_cast %87 : vector<32xf32> to vector<32x1xf32>
    %cst_48 = arith.constant 1.600000e+01 : f32
    %89 = vector.broadcast %cst_48 : f32 to vector<32x1xf32>
    %90 = arith.divf %88, %89 : vector<32x1xf32>
    %91 = vector.broadcast %90 : vector<32x1xf32> to vector<32x16xf32>
    %92 = arith.subf %75, %91 : vector<32x16xf32>
    %93 = arith.mulf %92, %92 : vector<32x16xf32>
    %cst_49 = arith.constant dense<0.000000e+00> : vector<32xf32>
    %94 = vector.multi_reduction <add>, %93, %cst_49 [1] : vector<32x16xf32> to vector<32xf32>
    %95 = vector.shape_cast %94 : vector<32xf32> to vector<32x1xf32>
    %96 = math.sqrt %95 : vector<32x1xf32>
    %cst_50 = arith.constant 9.99999993E-9 : f32
    %97 = vector.broadcast %cst_50 : f32 to vector<32x1xf32>
    %98 = arith.addf %96, %97 : vector<32x1xf32>
    %99 = vector.broadcast %98 : vector<32x1xf32> to vector<32x16xf32>
    %100 = arith.divf %92, %99 : vector<32x16xf32>
    %cst_51 = arith.constant dense<0.000000e+00> : vector<64x16xf32>
    %101 = tpu.matmul %4, %100, %cst_51 {dimension_numbers = #tpu.dot_dimension_numbers<[1], [0], [0], [1], [0, 0, 1, 1], [], []>} : vector<64x32xf32>, vector<32x16xf32>, vector<64x16xf32> -> vector<64x16xf32>
    %cst_52 = arith.constant dense<0.000000e+00> : vector<64x64xf32>
    %102 = tpu.matmul %101, %101, %cst_52 {dimension_numbers = #tpu.dot_dimension_numbers<[1], [1], [0], [0], [0, 0, 1, 0], [], []>} : vector<64x16xf32>, vector<64x16xf32>, vector<64x64xf32> -> vector<64x64xf32>
    %c1_53 = arith.constant 1 : index
    %c0_54 = arith.constant 0 : index
    %c0_55 = arith.constant 0 : index
    %c0_56 = arith.constant 0 : index
    %103 = vector.load %arg7[%c1_53, %c0_54, %c0_55, %c0_56] : memref<2x3x64x64xf32, #tpu.memory_space<vmem>>, vector<1x1x64x64xf32>
    %104 = vector.shape_cast %103 : vector<1x1x64x64xf32> to vector<64x64xf32>
    %105 = vector.shape_cast %79 : vector<64x64xf32> to vector<1x1x64x64xf32>
    tpu.vector_store %arg7[%c1_53, %c0_54, %c0_55, %c0_56], %105 {strides = array<i32>} : memref<2x3x64x64xf32, #tpu.memory_space<vmem>>, vector<1x1x64x64xf32>,
    %106 = vector.shape_cast %79 : vector<64x64xf32> to vector<1x64x64xf32>
    %cst_57 = arith.constant dense<0x7F800000> : vector<1xf32>
    %107 = vector.multi_reduction <minimumf>, %106, %cst_57 [1, 2] : vector<1x64x64xf32> to vector<1xf32>
    %108 = vector.shape_cast %107 : vector<1xf32> to vector<1x1x1xf32>
    %109 = vector.extract %108[0, 0, 0] : f32 from vector<1x1x1xf32>
    %110 = vector.broadcast %109 : f32 to vector<1x1xf32>
    %111 = vector.shape_cast %79 : vector<64x64xf32> to vector<1x64x64xf32>
    %cst_58 = arith.constant dense<0xFF800000> : vector<1xf32>
    %112 = vector.multi_reduction <maximumf>, %111, %cst_58 [1, 2] : vector<1x64x64xf32> to vector<1xf32>
    %113 = vector.shape_cast %112 : vector<1xf32> to vector<1x1x1xf32>
    %114 = vector.extract %113[0, 0, 0] : f32 from vector<1x1x1xf32>
    %115 = vector.broadcast %114 : f32 to vector<1x1xf32>
    %c1_59 = arith.constant 1 : index
    %c1_60 = arith.constant 1 : index
    %c0_61 = arith.constant 0 : index
    %c0_62 = arith.constant 0 : index
    %116 = vector.load %arg7[%c1_59, %c1_60, %c0_61, %c0_62] : memref<2x3x64x64xf32, #tpu.memory_space<vmem>>, vector<1x1x64x64xf32>
    %117 = vector.shape_cast %116 : vector<1x1x64x64xf32> to vector<64x64xf32>
    %118 = vector.shape_cast %86 : vector<64x64xf32> to vector<1x1x64x64xf32>
    tpu.vector_store %arg7[%c1_59, %c1_60, %c0_61, %c0_62], %118 {strides = array<i32>} : memref<2x3x64x64xf32, #tpu.memory_space<vmem>>, vector<1x1x64x64xf32>,
    %119 = vector.shape_cast %86 : vector<64x64xf32> to vector<1x64x64xf32>
    %cst_63 = arith.constant dense<0x7F800000> : vector<1xf32>
    %120 = vector.multi_reduction <minimumf>, %119, %cst_63 [1, 2] : vector<1x64x64xf32> to vector<1xf32>
    %121 = vector.shape_cast %120 : vector<1xf32> to vector<1x1x1xf32>
    %122 = vector.extract %121[0, 0, 0] : f32 from vector<1x1x1xf32>
    %123 = vector.broadcast %122 : f32 to vector<1x1xf32>
    %124 = vector.shape_cast %86 : vector<64x64xf32> to vector<1x64x64xf32>
    %cst_64 = arith.constant dense<0xFF800000> : vector<1xf32>
    %125 = vector.multi_reduction <maximumf>, %124, %cst_64 [1, 2] : vector<1x64x64xf32> to vector<1xf32>
    %126 = vector.shape_cast %125 : vector<1xf32> to vector<1x1x1xf32>
    %127 = vector.extract %126[0, 0, 0] : f32 from vector<1x1x1xf32>
    %128 = vector.broadcast %127 : f32 to vector<1x1xf32>
    %c1_65 = arith.constant 1 : index
    %c2_66 = arith.constant 2 : index
    %c0_67 = arith.constant 0 : index
    %c0_68 = arith.constant 0 : index
    %129 = vector.load %arg7[%c1_65, %c2_66, %c0_67, %c0_68] : memref<2x3x64x64xf32, #tpu.memory_space<vmem>>, vector<1x1x64x64xf32>
    %130 = vector.shape_cast %129 : vector<1x1x64x64xf32> to vector<64x64xf32>
    %131 = vector.shape_cast %102 : vector<64x64xf32> to vector<1x1x64x64xf32>
    tpu.vector_store %arg7[%c1_65, %c2_66, %c0_67, %c0_68], %131 {strides = array<i32>} : memref<2x3x64x64xf32, #tpu.memory_space<vmem>>, vector<1x1x64x64xf32>,
    %132 = vector.shape_cast %102 : vector<64x64xf32> to vector<1x64x64xf32>
    %cst_69 = arith.constant dense<0x7F800000> : vector<1xf32>
    %133 = vector.multi_reduction <minimumf>, %132, %cst_69 [1, 2] : vector<1x64x64xf32> to vector<1xf32>
    %134 = vector.shape_cast %133 : vector<1xf32> to vector<1x1x1xf32>
    %135 = vector.extract %134[0, 0, 0] : f32 from vector<1x1x1xf32>
    %136 = vector.broadcast %135 : f32 to vector<1x1xf32>
    %137 = vector.shape_cast %102 : vector<64x64xf32> to vector<1x64x64xf32>
    %cst_70 = arith.constant dense<0xFF800000> : vector<1xf32>
    %138 = vector.multi_reduction <maximumf>, %137, %cst_70 [1, 2] : vector<1x64x64xf32> to vector<1xf32>
    %139 = vector.shape_cast %138 : vector<1xf32> to vector<1x1x1xf32>
    %140 = vector.extract %139[0, 0, 0] : f32 from vector<1x1x1xf32>
    %141 = vector.broadcast %140 : f32 to vector<1x1xf32>
    %142 = arith.minimumf %42, %110 : vector<1x1xf32>
    %143 = arith.maximumf %47, %115 : vector<1x1xf32>
    %144 = arith.subf %143, %142 : vector<1x1xf32>
    %cst_71 = arith.constant 9.99999993E-9 : f32
    %145 = vector.broadcast %cst_71 : f32 to vector<1x1xf32>
    %146 = arith.addf %144, %145 : vector<1x1xf32>
    %147 = tpu.reciprocal %146 : vector<1x1xf32> -> vector<1x1xf32>
    %cst_72 = arith.constant 9.99999993E-9 : f32
    %148 = vector.broadcast %cst_72 : f32 to vector<1x1xf32>
    %149 = arith.cmpf olt, %144, %148 : vector<1x1xf32>
    %cst_73 = arith.constant 0.000000e+00 : f32
    %150 = vector.broadcast %cst_73 : f32 to vector<1x1xf32>
    %151 = arith.select %149, %150, %147 : vector<1x1xi1>, vector<1x1xf32>
    %c0_74 = arith.constant 0 : index
    %c0_75 = arith.constant 0 : index
    %c0_76 = arith.constant 0 : index
    %c0_77 = arith.constant 0 : index
    %152 = vector.load %arg7[%c0_74, %c0_75, %c0_76, %c0_77] : memref<2x3x64x64xf32, #tpu.memory_space<vmem>>, vector<1x1x64x64xf32>
    %153 = vector.shape_cast %152 : vector<1x1x64x64xf32> to vector<64x64xf32>
    %154 = vector.broadcast %142 : vector<1x1xf32> to vector<64x64xf32>
    %155 = arith.subf %153, %154 : vector<64x64xf32>
    %156 = vector.broadcast %151 : vector<1x1xf32> to vector<64x64xf32>
    %157 = arith.mulf %155, %156 : vector<64x64xf32>
    %c0_78 = arith.constant 0 : index
    %c0_79 = arith.constant 0 : index
    %c0_80 = arith.constant 0 : index
    %c0_81 = arith.constant 0 : index
    %158 = vector.load %arg7[%c0_78, %c0_79, %c0_80, %c0_81] : memref<2x3x64x64xf32, #tpu.memory_space<vmem>>, vector<1x1x64x64xf32>
    %159 = vector.shape_cast %158 : vector<1x1x64x64xf32> to vector<64x64xf32>
    %160 = vector.shape_cast %157 : vector<64x64xf32> to vector<1x1x64x64xf32>
    tpu.vector_store %arg7[%c0_78, %c0_79, %c0_80, %c0_81], %160 {strides = array<i32>} : memref<2x3x64x64xf32, #tpu.memory_space<vmem>>, vector<1x1x64x64xf32>,
    %c1_82 = arith.constant 1 : index
    %c0_83 = arith.constant 0 : index
    %c0_84 = arith.constant 0 : index
    %c0_85 = arith.constant 0 : index
    %161 = vector.load %arg7[%c1_82, %c0_83, %c0_84, %c0_85] : memref<2x3x64x64xf32, #tpu.memory_space<vmem>>, vector<1x1x64x64xf32>
    %162 = vector.shape_cast %161 : vector<1x1x64x64xf32> to vector<64x64xf32>
    %163 = vector.broadcast %142 : vector<1x1xf32> to vector<64x64xf32>
    %164 = arith.subf %162, %163 : vector<64x64xf32>
    %165 = vector.broadcast %151 : vector<1x1xf32> to vector<64x64xf32>
    %166 = arith.mulf %164, %165 : vector<64x64xf32>
    %c1_86 = arith.constant 1 : index
    %c0_87 = arith.constant 0 : index
    %c0_88 = arith.constant 0 : index
    %c0_89 = arith.constant 0 : index
    %167 = vector.load %arg7[%c1_86, %c0_87, %c0_88, %c0_89] : memref<2x3x64x64xf32, #tpu.memory_space<vmem>>, vector<1x1x64x64xf32>
    %168 = vector.shape_cast %167 : vector<1x1x64x64xf32> to vector<64x64xf32>
    %169 = vector.shape_cast %166 : vector<64x64xf32> to vector<1x1x64x64xf32>
    tpu.vector_store %arg7[%c1_86, %c0_87, %c0_88, %c0_89], %169 {strides = array<i32>} : memref<2x3x64x64xf32, #tpu.memory_space<vmem>>, vector<1x1x64x64xf32>,
    %170 = arith.minimumf %55, %123 : vector<1x1xf32>
    %171 = arith.maximumf %60, %128 : vector<1x1xf32>
    %172 = arith.subf %171, %170 : vector<1x1xf32>
    %cst_90 = arith.constant 9.99999993E-9 : f32
    %173 = vector.broadcast %cst_90 : f32 to vector<1x1xf32>
    %174 = arith.addf %172, %173 : vector<1x1xf32>
    %175 = tpu.reciprocal %174 : vector<1x1xf32> -> vector<1x1xf32>
    %cst_91 = arith.constant 9.99999993E-9 : f32
    %176 = vector.broadcast %cst_91 : f32 to vector<1x1xf32>
    %177 = arith.cmpf olt, %172, %176 : vector<1x1xf32>
    %cst_92 = arith.constant 0.000000e+00 : f32
    %178 = vector.broadcast %cst_92 : f32 to vector<1x1xf32>
    %179 = arith.select %177, %178, %175 : vector<1x1xi1>, vector<1x1xf32>
    %c0_93 = arith.constant 0 : index
    %c1_94 = arith.constant 1 : index
    %c0_95 = arith.constant 0 : index
    %c0_96 = arith.constant 0 : index
    %180 = vector.load %arg7[%c0_93, %c1_94, %c0_95, %c0_96] : memref<2x3x64x64xf32, #tpu.memory_space<vmem>>, vector<1x1x64x64xf32>
    %181 = vector.shape_cast %180 : vector<1x1x64x64xf32> to vector<64x64xf32>
    %182 = vector.broadcast %170 : vector<1x1xf32> to vector<64x64xf32>
    %183 = arith.subf %181, %182 : vector<64x64xf32>
    %184 = vector.broadcast %179 : vector<1x1xf32> to vector<64x64xf32>
    %185 = arith.mulf %183, %184 : vector<64x64xf32>
    %c0_97 = arith.constant 0 : index
    %c1_98 = arith.constant 1 : index
    %c0_99 = arith.constant 0 : index
    %c0_100 = arith.constant 0 : index
    %186 = vector.load %arg7[%c0_97, %c1_98, %c0_99, %c0_100] : memref<2x3x64x64xf32, #tpu.memory_space<vmem>>, vector<1x1x64x64xf32>
    %187 = vector.shape_cast %186 : vector<1x1x64x64xf32> to vector<64x64xf32>
    %188 = vector.shape_cast %185 : vector<64x64xf32> to vector<1x1x64x64xf32>
    tpu.vector_store %arg7[%c0_97, %c1_98, %c0_99, %c0_100], %188 {strides = array<i32>} : memref<2x3x64x64xf32, #tpu.memory_space<vmem>>, vector<1x1x64x64xf32>,
    %c1_101 = arith.constant 1 : index
    %c1_102 = arith.constant 1 : index
    %c0_103 = arith.constant 0 : index
    %c0_104 = arith.constant 0 : index
    %189 = vector.load %arg7[%c1_101, %c1_102, %c0_103, %c0_104] : memref<2x3x64x64xf32, #tpu.memory_space<vmem>>, vector<1x1x64x64xf32>
    %190 = vector.shape_cast %189 : vector<1x1x64x64xf32> to vector<64x64xf32>
    %191 = vector.broadcast %170 : vector<1x1xf32> to vector<64x64xf32>
    %192 = arith.subf %190, %191 : vector<64x64xf32>
    %193 = vector.broadcast %179 : vector<1x1xf32> to vector<64x64xf32>
    %194 = arith.mulf %192, %193 : vector<64x64xf32>
    %c1_105 = arith.constant 1 : index
    %c1_106 = arith.constant 1 : index
    %c0_107 = arith.constant 0 : index
    %c0_108 = arith.constant 0 : index
    %195 = vector.load %arg7[%c1_105, %c1_106, %c0_107, %c0_108] : memref<2x3x64x64xf32, #tpu.memory_space<vmem>>, vector<1x1x64x64xf32>
    %196 = vector.shape_cast %195 : vector<1x1x64x64xf32> to vector<64x64xf32>
    %197 = vector.shape_cast %194 : vector<64x64xf32> to vector<1x1x64x64xf32>
    tpu.vector_store %arg7[%c1_105, %c1_106, %c0_107, %c0_108], %197 {strides = array<i32>} : memref<2x3x64x64xf32, #tpu.memory_space<vmem>>, vector<1x1x64x64xf32>,
    %198 = arith.minimumf %68, %136 : vector<1x1xf32>
    %199 = arith.maximumf %73, %141 : vector<1x1xf32>
    %200 = arith.subf %199, %198 : vector<1x1xf32>
    %cst_109 = arith.constant 9.99999993E-9 : f32
    %201 = vector.broadcast %cst_109 : f32 to vector<1x1xf32>
    %202 = arith.addf %200, %201 : vector<1x1xf32>
    %203 = tpu.reciprocal %202 : vector<1x1xf32> -> vector<1x1xf32>
    %cst_110 = arith.constant 9.99999993E-9 : f32
    %204 = vector.broadcast %cst_110 : f32 to vector<1x1xf32>
    %205 = arith.cmpf olt, %200, %204 : vector<1x1xf32>
    %cst_111 = arith.constant 0.000000e+00 : f32
    %206 = vector.broadcast %cst_111 : f32 to vector<1x1xf32>
    %207 = arith.select %205, %206, %203 : vector<1x1xi1>, vector<1x1xf32>
    %c0_112 = arith.constant 0 : index
    %c2_113 = arith.constant 2 : index
    %c0_114 = arith.constant 0 : index
    %c0_115 = arith.constant 0 : index
    %208 = vector.load %arg7[%c0_112, %c2_113, %c0_114, %c0_115] : memref<2x3x64x64xf32, #tpu.memory_space<vmem>>, vector<1x1x64x64xf32>
    %209 = vector.shape_cast %208 : vector<1x1x64x64xf32> to vector<64x64xf32>
    %210 = vector.broadcast %198 : vector<1x1xf32> to vector<64x64xf32>
    %211 = arith.subf %209, %210 : vector<64x64xf32>
    %212 = vector.broadcast %207 : vector<1x1xf32> to vector<64x64xf32>
    %213 = arith.mulf %211, %212 : vector<64x64xf32>
    %c0_116 = arith.constant 0 : index
    %c2_117 = arith.constant 2 : index
    %c0_118 = arith.constant 0 : index
    %c0_119 = arith.constant 0 : index
    %214 = vector.load %arg7[%c0_116, %c2_117, %c0_118, %c0_119] : memref<2x3x64x64xf32, #tpu.memory_space<vmem>>, vector<1x1x64x64xf32>
    %215 = vector.shape_cast %214 : vector<1x1x64x64xf32> to vector<64x64xf32>
    %216 = vector.shape_cast %213 : vector<64x64xf32> to vector<1x1x64x64xf32>
    tpu.vector_store %arg7[%c0_116, %c2_117, %c0_118, %c0_119], %216 {strides = array<i32>} : memref<2x3x64x64xf32, #tpu.memory_space<vmem>>, vector<1x1x64x64xf32>,
    %c1_120 = arith.constant 1 : index
    %c2_121 = arith.constant 2 : index
    %c0_122 = arith.constant 0 : index
    %c0_123 = arith.constant 0 : index
    %217 = vector.load %arg7[%c1_120, %c2_121, %c0_122, %c0_123] : memref<2x3x64x64xf32, #tpu.memory_space<vmem>>, vector<1x1x64x64xf32>
    %218 = vector.shape_cast %217 : vector<1x1x64x64xf32> to vector<64x64xf32>
    %219 = vector.broadcast %198 : vector<1x1xf32> to vector<64x64xf32>
    %220 = arith.subf %218, %219 : vector<64x64xf32>
    %221 = vector.broadcast %207 : vector<1x1xf32> to vector<64x64xf32>
    %222 = arith.mulf %220, %221 : vector<64x64xf32>
    %c1_124 = arith.constant 1 : index
    %c2_125 = arith.constant 2 : index
    %c0_126 = arith.constant 0 : index
    %c0_127 = arith.constant 0 : index
    %223 = vector.load %arg7[%c1_124, %c2_125, %c0_126, %c0_127] : memref<2x3x64x64xf32, #tpu.memory_space<vmem>>, vector<1x1x64x64xf32>
    %224 = vector.shape_cast %223 : vector<1x1x64x64xf32> to vector<64x64xf32>
    %225 = vector.shape_cast %222 : vector<64x64xf32> to vector<1x1x64x64xf32>
    tpu.vector_store %arg7[%c1_124, %c2_125, %c0_126, %c0_127], %225 {strides = array<i32>} : memref<2x3x64x64xf32, #tpu.memory_space<vmem>>, vector<1x1x64x64xf32>,
    return
  }
  func.func @transform_0(%arg0: i32) -> (i32, i32, i32) {
    %c0_i32 = arith.constant 0 : i32
    %c0_i32_0 = arith.constant 0 : i32
    %c0_i32_1 = arith.constant 0 : i32
    %c0_i32_2 = arith.constant 0 : i32
    return %c0_i32, %c0_i32_0, %c0_i32_1 : i32, i32, i32
  }
  func.func @transform_1(%arg0: i32) -> (i32, i32) {
    %c0_i32 = arith.constant 0 : i32
    %c0_i32_0 = arith.constant 0 : i32
    %c0_i32_1 = arith.constant 0 : i32
    return %c0_i32, %c0_i32_0 : i32, i32
  }
  func.func @transform_2(%arg0: i32) -> (i32, i32) {
    %c0_i32 = arith.constant 0 : i32
    %c0_i32_0 = arith.constant 0 : i32
    %c0_i32_1 = arith.constant 0 : i32
    return %c0_i32, %c0_i32_0 : i32, i32
  }
  func.func @transform_3(%arg0: i32) -> (i32, i32) {
    %c0_i32 = arith.constant 0 : i32
    %c0_i32_0 = arith.constant 0 : i32
    %c0_i32_1 = arith.constant 0 : i32
    return %c0_i32, %c0_i32_0 : i32, i32
  }
  func.func @transform_4(%arg0: i32) -> (i32, i32) {
    %c0_i32 = arith.constant 0 : i32
    %c0_i32_0 = arith.constant 0 : i32
    %c0_i32_1 = arith.constant 0 : i32
    return %c0_i32, %c0_i32_0 : i32, i32
  }
  func.func @transform_5(%arg0: i32) -> (i32, i32) {
    %c0_i32 = arith.constant 0 : i32
    %c0_i32_0 = arith.constant 0 : i32
    %c0_i32_1 = arith.constant 0 : i32
    return %c0_i32, %c0_i32_0 : i32, i32
  }
  func.func @transform_6(%arg0: i32) -> (i32, i32, i32, i32) {
    %c0_i32 = arith.constant 0 : i32
    %c0_i32_0 = arith.constant 0 : i32
    %c0_i32_1 = arith.constant 0 : i32
    %c0_i32_2 = arith.constant 0 : i32
    %c0_i32_3 = arith.constant 0 : i32
    return %c0_i32, %c0_i32_0, %c0_i32_1, %c0_i32_2 : i32, i32, i32, i32
  }
}

</mosaic_0001>

<bundles_post_ra>
// kernel: multi_perspective_visual_encoder.1
= control target key start
LH: loop header
LB: loop body
LE: loop exit
PB: predicated region body
PF: predicated region fallthrough
CT: control target
= control target key end

     0   :  { %11 = vsyncpa [#allocation3], 0  ;;  %s3148_s0 = inlined_call_operand.vmem [shape: f32[2,32,16], index: 0, kind: input, shape index: {}]   ;;  %s3149_s1 = inlined_call_operand.hbm [shape: f32[64,32], index: 1, kind: input, shape index: {}]   ;;  %s3150_s2 = inlined_call_operand.hbm [shape: f32[64,32], index: 2, kind: input, shape index: {}]   ;;  %s3151_s3 = inlined_call_operand.hbm [shape: f32[64,16], index: 3, kind: input, shape index: {}]   ;;  %s3152_s4 = inlined_call_operand.hbm [shape: f32[64,16], index: 4, kind: input, shape index: {}]   ;;  %s3153_s5 = inlined_call_operand.vmem [shape: f32[64,32], index: 5, kind: input, shape index: {}]   ;;  %s3154_s6 = inlined_call_operand.hbm [shape: f32[2,3,64,64], index: 6, kind: output, shape index: {}]  }
   0x1   :  { %12 = vsyncpa [#allocation6], 0 }
   0x2   :  { %13 = vsyncpa [#allocation9], 0 }
   0x3   :  { %14 = vsyncpa [#allocation4], 0  ;;  %s34_s23 = sshll.u32 %s3150_s2, 4  ;;  %s2070_s24 = smov [#allocation5]   ;;  %s35_s23 = int_to_ptr.hbm [resolvable:$true] %s34_s23 }
   0x4   :  { %s36_s25 = sshll.u32 %s2070_s24, 4  ;;  %s21_s28 = sshll.u32 %s3149_s1, 4  ;;  %s37_s25 = int_to_ptr.vmem [resolvable:$true] %s36_s25  ;;  %s22_s28 = int_to_ptr.hbm [resolvable:$true] %s21_s28 }
   0x5   :  { %s2071_s29 = smov 128   ;;  %s2072_s30 = smov 8  }
   0x6   :  { %42 = dma.hbm_to_vmem [thread:$0]  %s35_s23, 1024, %s37_s25, [#allocation6], %s2071_s29, %s2071_s29, %s2072_s30  }
   0x7   :  { %s2073_s7 = smov [#allocation2]   ;;  %s47_s2 = sshll.u32 %s3151_s3, 4  ;;  %s48_s2 = int_to_ptr.hbm [resolvable:$true] %s47_s2 }
   0x8   :  { %s23_s8 = sshll.u32 %s2073_s7, 4  ;;  %s60_s12 = sshll.u32 %s3152_s4, 4  ;;  %s24_s8 = int_to_ptr.vmem [resolvable:$true] %s23_s8  ;;  %s61_s12 = int_to_ptr.hbm [resolvable:$true] %s60_s12 }
   0x9   :  { %29 = dma.hbm_to_vmem [thread:$0]  %s22_s28, 1024, %s24_s8, [#allocation3], %s2071_s29, %s2071_s29, %s2072_s30  }
   0xa   :  { %s2074_s13 = smov [#allocation7]   ;;  %s2075_s15 = smov [#allocation8]  }
   0xb   :  { %s49_s14 = sshll.u32 %s2074_s13, 4  ;;  %s62_s3 = sshll.u32 %s2075_s15, 4  ;;  %s50_s14 = int_to_ptr.vmem [resolvable:$true] %s49_s14  ;;  %s63_s3 = int_to_ptr.vmem [resolvable:$true] %s62_s3 }
   0xc   :  { %55 = dma.hbm_to_vmem [thread:$0]  %s48_s2, 1024, %s50_s14, [#allocation6], %s2071_s29, %s2071_s29, %s2072_s30  }
   0xd   :  { %68 = dma.hbm_to_vmem [thread:$0]  %s61_s12, 1024, %s63_s3, [#allocation9], %s2071_s29, %s2071_s29, %s2072_s30  }
   0xe   :  { %2062 = dma.done.wait [#allocation3], 1024  }
   0xf   :  { %2063 = vsyncadd [#allocation3], 4294966272 }
  0x10   :  { %2064 = dma.done.wait [#allocation6], 2048  }
  0x11   :  { %2065 = vsyncadd [#allocation6], 4294965248 }
  0x12   :  { %2066 = dma.done.wait [#allocation9], 1024  }
  0x13   :  { %2067 = vsyncadd [#allocation9], 4294966272  ;;  %vm131_vm0 = vcmask 130048   ;;  %v130_v0 = vld [vmem:[%s3148_s0 + $0x18] sm:$0xff]  ;;  %v128_v1 = vld [vmem:[%s3148_s0 + $0x8] sm:$0xff]  ;;  %v2076_v11 = vmov 16.0  }
  0x14   :  { %v271_v2 = vsel %vm131_vm0, %v130_v0, 0.0  ;;  %v267_v3 = vsel %vm131_vm0, %v128_v1, 0.0  ;;  %v2150_v4 = vld [vmem:[%s3148_s0 + $0x10] sm:$0xff]  ;;  %v2155_v5 = vld [vmem:[%s3148_s0] sm:$0xff]  ;;  %1740 = vmatpush.xpose.msk.msra.mxu3 %vm131_vm0, %v130_v0  ;;  %1900 = vrcp.f32 %v2076_v11  ;;  %v2077_v15 = vmov 32.0   ;;  %v2172_v17 = vld [vmem:[%s3148_s0 + $0x28] sm:$0xff] }
  0x15   :  { %390 = vadd.xlane.f32.xlu0 %v271_v2  ;;  %386 = vadd.xlane.f32.xlu1 %v267_v3  ;;  %v266_v6 = vsel %vm131_vm0, %v2155_v5, 0.0  ;;  %v269_v8 = vsel %vm131_vm0, %v2150_v4, 0.0  ;;  %1902 = vrcp.f32 %v2077_v15  ;;  %v2177_v19 = vld [vmem:[%s3148_s0 + $0x30] sm:$0xff]  ;;  %v2182_v20 = vld [vmem:[%s3148_s0 + $0x20] sm:$0xff]  ;;  %v954_v22 = vsel %vm131_vm0, %v2172_v17, 0.0  ;;  %v2191_v24 = vld [vmem:[%s3148_s0 + $0x38] sm:$0xff] }
  0x16   :  { %v268_v7 = vadd.f32 %v267_v3, %v266_v6  ;;  %v953_v23 = vsel %vm131_vm0, %v2182_v20, 0.0  ;;  %v956_v27 = vsel %vm131_vm0, %v2177_v19, 0.0  ;;  %v958_v30 = vsel %vm131_vm0, %v2191_v24, 0.0  ;;  %s2079_s0 = smov [#allocation10]   ;;  %s1725_s1 = sshll.u32 %s3154_s6, 4  ;;  %s1726_s1 = int_to_ptr.hbm [resolvable:$true] %s1725_s1 }
  0x17   :  { %v955_v25 = vadd.f32 %v954_v22, %v953_v23  ;;  %v2078_v15 = vmov 0.0625   ;;  %s1723_s9 = sshll.u32 %s2079_s0, 4  ;;  %s1724_s9 = int_to_ptr.vmem [resolvable:$true] %s1723_s9 }
  0x18   :  { %v270_v9 = vadd.f32 %v269_v8, %v268_v7  ;;  %1741 = vmatpush.xpose.msk.msra.mxu3 %vm131_vm0, %v2150_v4 }
  0x19   :  { %v957_v28 = vadd.f32 %v956_v27, %v955_v25 }
  0x1a   :  { %v2164_v10 = vadd.f32 %v271_v2, %v270_v9  ;;  %v1901_v12 = vpop.eup %1900 }
  0x1b   :  { %v393_v13 = vmul.f32 16.0, %v1901_v12  ;;  %v1903_v18 = vpop.eup %1902  ;;  %vm397_vm1 = vweird.f32 %v1901_v12  ;;  %v959_v31 = vadd.f32 %v958_v30, %v957_v28 }
  0x1c   :  { %1742 = vmatpush.xpose.msk.msra.mxu3 %vm131_vm0, %v128_v1  ;;  %v280_v26 = vmul.f32 32.0, %v1903_v18  ;;  %vm284_vm2 = vweird.f32 %v1903_v18 }
  0x1d   :  { %388 = vadd.xlane.f32.xlu0 %v269_v8  ;;  %384 = vadd.xlane.f32.xlu1 %v266_v6  ;;  %v394_v14 = vsub.f32 1.0, %v393_v13  ;;  %v960_v37 = vrot.slane %v959_v31, 4 }
  0x1e   :  { %v281_v32 = vsub.f32 1.0, %v280_v26 }
  0x1f   :  { %v395_v16 = vmul.f32 %v1901_v12, %v394_v14  ;;  %v961_v40 = vadd.f32 %v960_v37, %v959_v31 }
  0x20   :  { %1743 = vmatpush.xpose.msk.msra.mxu3 %vm131_vm0, %v2155_v5  ;;  %v282_v41 = vmul.f32 %v1903_v18, %v281_v32 }
  0x21   :  { %v396_v21 = vadd.f32 %v1901_v12, %v395_v16  ;;  %v962_v44 = vrot.slane %v961_v40, 2 }
  0x22   :  { %v283_v48 = vadd.f32 %v1903_v18, %v282_v41 }
  0x23   :  { %v2195_v29 = vsel %vm397_vm1, %v1901_v12, %v396_v21  ;;  %v963_v47 = vadd.f32 %v962_v44, %v961_v40  ;;  %1744 = vmatmul.msk.f32.vlgmr.msra.gmra.mxu3 %vm131_vm0, %v2078_v15 }
  0x24   :  { %v2219_v57 = vsel %vm284_vm2, %v1903_v18, %v283_v48 }
  0x25   :  { %v964_v53 = vrot.slane %v963_v47, 1 }
  0x27   :  { %v965_v56 = vadd.f32 %v964_v53, %v963_v47 }
  0x29   :  { %v2226_v60 = vmul.f32 %v965_v56, %v2219_v57 }
  0x88   :  { %v391_v33 = vpop.xlane.xlu0 %390  ;;  %v387_v34 = vpop.xlane.xlu1 %386 }
  0x89   :  { %v402_v35 = vmul.f32 %v2195_v29, %v391_v33  ;;  %v400_v36 = vmul.f32 %v2195_v29, %v387_v34 }
  0x8b   :  { %v2201_v38 = vsub.f32 %v130_v0, %v402_v35  ;;  %v2203_v39 = vsub.f32 %v128_v1, %v400_v36 }
  0x8d   :  { %v410_v42 = vmul.f32 %v2201_v38, %v2201_v38  ;;  %v408_v43 = vmul.f32 %v2203_v39, %v2203_v39 }
  0x8f   :  { %v420_v45 = vsel %vm131_vm0, %v410_v42, 0.0  ;;  %v414_v46 = vsel %vm131_vm0, %v408_v43, 0.0 }
  0x90   :  { %421 = vadd.xlane.f32.xlu2 %v420_v45  ;;  %v389_v49 = vpop.xlane.xlu0 %388  ;;  %415 = vadd.xlane.f32.xlu0 %v414_v46  ;;  %v385_v50 = vpop.xlane.xlu1 %384 }
  0x91   :  { %v401_v51 = vmul.f32 %v2195_v29, %v389_v49  ;;  %v399_v52 = vmul.f32 %v2195_v29, %v385_v50 }
  0x93   :  { %v2214_v54 = vsub.f32 %v2150_v4, %v401_v51  ;;  %v2217_v55 = vsub.f32 %v2155_v5, %v399_v52 }
  0x95   :  { %v409_v58 = vmul.f32 %v2214_v54, %v2214_v54  ;;  %v407_v59 = vmul.f32 %v2217_v55, %v2217_v55 }
  0x97   :  { %v417_v61 = vsel %vm131_vm0, %v409_v58, 0.0  ;;  %v411_v62 = vsel %vm131_vm0, %v407_v59, 0.0 }
  0x98   :  { %418 = vadd.xlane.f32.xlu2 %v417_v61  ;;  %1044 = vadd.xlane.f32.xlu0 %v956_v27 }
  0x99   :  { %412 = vadd.xlane.f32.xlu1 %v411_v62 }
  0xa0   :  { %1046 = vadd.xlane.f32.xlu2 %v958_v30 }
  0xa1   :  { %1042 = vadd.xlane.f32.xlu1 %v954_v22 }
  0xa8   :  { %1040 = vadd.xlane.f32.xlu2 %v953_v23 }
 0x103   :  { %v422_v63 = vpop.xlane.xlu2 %421  ;;  %v416_v0 = vpop.xlane.xlu0 %415 }
 0x104   :  { %1904 = vrsqrt.f32 %v422_v63  ;;  %vm466_vm3 = vcmp.eq.f32.partialorder %v422_v63, inf  ;;  %vm468_vm4 = vcmp.eq.f32.partialorder %v422_v63, 0.0  ;;  %v469_v30 = vand.u32 2147483648, %v422_v63 }
 0x105   :  { %1906 = vrsqrt.f32 %v416_v0  ;;  %vm442_vm5 = vcmp.eq.f32.partialorder %v416_v0, inf  ;;  %vm444_vm6 = vcmp.eq.f32.partialorder %v416_v0, 0.0  ;;  %v445_v44 = vand.u32 2147483648, %v416_v0 }
 0x10a   :  { %v1905_v1 = vpop.eup %1904 }
 0x10b   :  { %v1907_v2 = vpop.eup %1906  ;;  %v460_v3 = vmul.f32 %v1905_v1, %v422_v63  ;;  %v2230_v4 = vpop.xlane.xlu2 %418 }
 0x10c   :  { %v1045_v5 = vpop.xlane.xlu0 %1044  ;;  %v436_v6 = vmul.f32 %v1907_v2, %v416_v0  ;;  %1908 = vrsqrt.f32 %v2230_v4  ;;  %v2233_v7 = vpop.xlane.xlu1 %412  ;;  %vm454_vm7 = vcmp.eq.f32.partialorder %v2230_v4, inf  ;;  %vm456_vm8 = vcmp.eq.f32.partialorder %v2230_v4, 0.0 }
 0x10d   :  { %v461_v8 = vmul.f32 %v1905_v1, %v460_v3  ;;  %v1050_v9 = vmul.f32 %v1045_v5, %v2195_v29  ;;  %1910 = vrsqrt.f32 %v2233_v7  ;;  %v457_v5 = vand.u32 2147483648, %v2230_v4 }
 0x10e   :  { %v437_v11 = vmul.f32 %v1907_v2, %v436_v6  ;;  %vm430_vm9 = vcmp.eq.f32.partialorder %v2233_v7, inf  ;;  %vm432_vm10 = vcmp.eq.f32.partialorder %v2233_v7, 0.0 }
 0x10f   :  { %v462_v12 = vmul.f32 0.5, %v461_v8  ;;  %v2238_v13 = vsub.f32 %v2177_v19, %v1050_v9 }
 0x110   :  { %v438_v14 = vmul.f32 0.5, %v437_v11 }
 0x111   :  { %v463_v16 = vsub.f32 1.5, %v462_v12  ;;  %v1058_v18 = vmul.f32 %v2238_v13, %v2238_v13 }
 0x112   :  { %v1909_v21 = vpop.eup %1908  ;;  %v439_v22 = vsub.f32 1.5, %v438_v14 }
 0x113   :  { %v1911_v23 = vpop.eup %1910  ;;  %v464_v25 = vmul.f32 %v1905_v1, %v463_v16  ;;  %v448_v26 = vmul.f32 %v1909_v21, %v2230_v4  ;;  %v1047_v27 = vpop.xlane.xlu2 %1046  ;;  %v1066_v28 = vsel %vm131_vm0, %v1058_v18, 0.0 }
 0x114   :  { %v440_v31 = vmul.f32 %v1907_v2, %v439_v22  ;;  %v424_v32 = vmul.f32 %v1911_v23, %v2233_v7  ;;  %v1051_v33 = vmul.f32 %v1047_v27, %v2195_v29  ;;  %1067 = vadd.xlane.f32.xlu1 %v1066_v28  ;;  %v1043_v34 = vpop.xlane.xlu1 %1042 }
 0x115   :  { %v465_v35 = vmul.f32 %v464_v25, %v422_v63  ;;  %v449_v36 = vmul.f32 %v1909_v21, %v448_v26  ;;  %v1049_v37 = vmul.f32 %v1043_v34, %v2195_v29 }
 0x116   :  { %v441_v40 = vmul.f32 %v440_v31, %v416_v0  ;;  %v425_v41 = vmul.f32 %v1911_v23, %v424_v32  ;;  %v2250_v42 = vsub.f32 %v2191_v24, %v1051_v33 }
 0x117   :  { %v467_v43 = vsel %vm466_vm3, %v422_v63, %v465_v35  ;;  %v450_v45 = vmul.f32 0.5, %v449_v36  ;;  %v2254_v46 = vsub.f32 %v2172_v17, %v1049_v37 }
 0x118   :  { %v470_v47 = vsel %vm468_vm4, %v469_v30, %v467_v43  ;;  %v443_v48 = vsel %vm442_vm5, %v416_v0, %v441_v40  ;;  %v426_v49 = vmul.f32 0.5, %v425_v41  ;;  %v1059_v50 = vmul.f32 %v2250_v42, %v2250_v42 }
 0x119   :  { %v446_v51 = vsel %vm444_vm6, %v445_v44, %v443_v48  ;;  %v451_v52 = vsub.f32 1.5, %v450_v45  ;;  %v1057_v53 = vmul.f32 %v2254_v46, %v2254_v46  ;;  %v474_v56 = vadd.f32 1e-08, %v470_v47 }
 0x11a   :  { %v427_v58 = vsub.f32 1.5, %v426_v49  ;;  %v1069_v59 = vsel %vm131_vm0, %v1059_v50, 0.0  ;;  %v2262_v61 = vadd.f32 1e-08, %v446_v51 }
 0x11b   :  { %v452_v62 = vmul.f32 %v1909_v21, %v451_v52  ;;  %v1041_v1 = vpop.xlane.xlu2 %1040  ;;  %1070 = vadd.xlane.f32.xlu0 %v1069_v59  ;;  %v1063_v63 = vsel %vm131_vm0, %v1057_v53, 0.0  ;;  %1912 = vrcp.f32 %v474_v56  ;;  %v531_v28 = vand.u32 2147483648, %v474_v56 }
 0x11c   :  { %v428_v0 = vmul.f32 %v1911_v23, %v427_v58  ;;  %v1048_v2 = vmul.f32 %v1041_v1, %v2195_v29  ;;  %1064 = vadd.xlane.f32.xlu2 %v1063_v63  ;;  %1914 = vrcp.f32 %v2262_v61  ;;  %v433_v29 = vand.u32 2147483648, %v2233_v7 }
 0x11d   :  { %v453_v3 = vmul.f32 %v452_v62, %v2230_v4  ;;  %vm525_vm12 = vweird.f32 %v474_v56  ;;  %v532_v35 = vor.u32 1.1754944e-38, %v531_v28  ;;  %vm495_vm1 = vweird.f32 %v2262_v61 }
 0x11e   :  { %v429_v6 = vmul.f32 %v428_v0, %v2233_v7  ;;  %v2272_v8 = vsub.f32 %v2182_v20, %v1048_v2  ;;  %v501_v49 = vand.u32 2147483648, %v2262_v61  ;;  %v499_v53 = vand.u32 2147483647, %v2262_v61 }
 0x11f   :  { %v455_v9 = vsel %vm454_vm7, %v2230_v4, %v453_v3 }
 0x120   :  { %v458_v11 = vsel %vm456_vm8, %v457_v5, %v455_v9  ;;  %v431_v12 = vsel %vm430_vm9, %v2233_v7, %v429_v6  ;;  %v1056_v14 = vmul.f32 %v2272_v8, %v2272_v8  ;;  %v529_v7 = vand.u32 2147483647, %v474_v56 }
 0x121   :  { %v1913_v16 = vpop.eup %1912  ;;  %v434_v18 = vsel %vm432_vm10, %v433_v29, %v431_v12  ;;  %v473_v21 = vadd.f32 1e-08, %v458_v11  ;;  %v502_v0 = vor.u32 1.1754944e-38, %v501_v49  ;;  %vm500_vm9 = vcmp.eq.f32.partialorder %v499_v53, 8.507059e+37  ;;  %v2422_v49 = vld [vmem:[#allocation5 + $0x10] sm:$0xff] }
 0x122   :  { %v1060_v22 = vsel %vm131_vm0, %v1056_v14, 0.0  ;;  %v521_v23 = vmul.f32 %v1913_v16, %v474_v56  ;;  %v471_v25 = vadd.f32 1e-08, %v434_v18  ;;  %v1915_v4 = vpop.eup %1914  ;;  %vm526_vm11 = vweird.f32 %v1913_v16  ;;  %v118_v18 = vld [vmem:[#allocation8 + $0x38] sm:$0xff]  ;;  %v164_v56 = vpop.f32.mrf.mxu3 }
 0x123   :  { %1061 = vadd.xlane.f32.xlu0 %v1060_v22  ;;  %1916 = vrcp.f32 %v473_v21  ;;  %v491_v27 = vmul.f32 %v1915_v4, %v2262_v61  ;;  %vm527_vm13 = vmor %vm525_vm12, %vm526_vm11  ;;  %vm530_vm14 = vcmp.eq.f32.partialorder %v529_v7, 8.507059e+37  ;;  %vm496_vm15 = vweird.f32 %v1915_v4  ;;  %1761 = vmatpush.xpose.msk.msra.mxu2 %vm131_vm0, %v118_v18  ;;  %v117_v22 = vld [vmem:[#allocation8 + $0x30] sm:$0xff] }
 0x124   :  { %v522_v26 = vsub.f32 1.0, %v521_v23  ;;  %1918 = vrcp.f32 %v471_v25  ;;  %v516_v48 = vand.u32 2147483648, %v473_v21  ;;  %v514_v52 = vand.u32 2147483647, %v473_v21  ;;  %vm2288_vm3 = vmor %vm495_vm1, %vm496_vm15  ;;  %v2384_v7 = vld [vmem:[#allocation8 + $0x10] sm:$0xff] }
 0x125   :  { %v492_v31 = vsub.f32 1.0, %v491_v27  ;;  %v486_v58 = vand.u32 2147483648, %v471_v25  ;;  %vm510_vm5 = vweird.f32 %v473_v21  ;;  %v484_v1 = vand.u32 2147483647, %v471_v25  ;;  %v2372_v27 = vld [vmem:[#allocation5 + $0x38] sm:$0xff] }
 0x126   :  { %v523_v30 = vmul.f32 %v1913_v16, %v522_v26  ;;  %v517_v63 = vor.u32 1.1754944e-38, %v516_v48  ;;  %vm480_vm7 = vweird.f32 %v471_v25  ;;  %vm515_vm8 = vcmp.eq.f32.partialorder %v514_v52, 8.507059e+37  ;;  %v2368_v26 = vld [vmem:[#allocation8 + $0x20] sm:$0xff] }
 0x127   :  { %v493_v33 = vmul.f32 %v1915_v4, %v492_v31  ;;  %v487_v9 = vor.u32 1.1754944e-38, %v486_v58  ;;  %vm485_vm11 = vcmp.eq.f32.partialorder %v484_v1, 8.507059e+37  ;;  %vm176_vm12 = vcmask 261120   ;;  %1762 = vmatpush.xpose.msk.msra.mxu2 %vm131_vm0, %v117_v22 }
 0x128   :  { %v524_v32 = vadd.f32 %v1913_v16, %v523_v30  ;;  %1745 = vmatpush.xpose.msk.msra.mxu1 %vm176_vm12, %v2372_v27  ;;  %v2376_v30 = vld [vmem:[#allocation8 + $0x18] sm:$0xff] }
 0x129   :  { %v1917_v34 = vpop.eup %1916  ;;  %v494_v47 = vadd.f32 %v1915_v4, %v493_v33 }
 0x12a   :  { %v1919_v36 = vpop.eup %1918  ;;  %v528_v37 = vsel %vm527_vm13, %v1913_v16, %v524_v32  ;;  %v506_v40 = vmul.f32 %v1917_v34, %v473_v21  ;;  %vm511_vm2 = vweird.f32 %v1917_v34  ;;  %v2300_v16 = vld [vmem:[%s3153_s5] sm:$0xff]  ;;  %v273_v21 = vrot.slane %v2164_v10, 4  ;;  %v2388_v32 = vld [vmem:[#allocation5 + $0x28] sm:$0xff] }
 0x12b   :  { %v533_v41 = vsel %vm530_vm14, %v532_v35, %v528_v37  ;;  %v476_v43 = vmul.f32 %v1919_v36, %v471_v25  ;;  %vm481_vm4 = vweird.f32 %v1919_v36  ;;  %v498_v62 = vsel %vm2288_vm3, %v1915_v4, %v494_v47  ;;  %vm512_vm6 = vmor %vm510_vm5, %vm511_vm2  ;;  %v116_v25 = vld [vmem:[#allocation8 + $0x28] sm:$0xff]  ;;  %v2396_v35 = vld [vmem:[#allocation5 + $0x20] sm:$0xff] }
 0x12c   :  { %v534_v44 = vmul.f32 %v533_v41, %v2201_v38  ;;  %v507_v45 = vsub.f32 1.0, %v506_v40  ;;  %vm482_vm10 = vmor %vm480_vm7, %vm481_vm4  ;;  %v503_v5 = vsel %vm500_vm9, %v502_v0, %v498_v62  ;;  %v274_v23 = vadd.f32 %v273_v21, %v2164_v10  ;;  %1763 = vmatpush.xpose.msk.msra.mxu2 %vm131_vm0, %v116_v25  ;;  %v2380_v10 = vld [vmem:[#allocation5 + $0x30] sm:$0xff]  ;;  %v2405_v41 = vld [vmem:[#allocation8] sm:$0xff] }
 0x12d   :  { %v477_v50 = vsub.f32 1.0, %v476_v43  ;;  %v504_v12 = vmul.f32 %v503_v5, %v2203_v39  ;;  %v2309_v39 = vld [vmem:[%s3153_s5 + $0x8] sm:$0xff]  ;;  %1746 = vmatpush.xpose.msk.msra.mxu1 %vm176_vm12, %v2380_v10  ;;  %v2407_v43 = vld [vmem:[#allocation5 + $0x18] sm:$0xff] }
 0x12e   :  { %571 = vmatpush.msrb.mxu3 %v534_v44  ;;  %v508_v51 = vmul.f32 %v1917_v34, %v507_v45  ;;  %v275_v4 = vrot.slane %v274_v23, 2  ;;  %v2409_v44 = vld [vmem:[#allocation7] sm:$0xff]  ;;  %v2433_v62 = vld [vmem:[#allocation5 + $0x8] sm:$0xff] }
 0x12f   :  { %v478_v38 = vmul.f32 %v1919_v36, %v477_v50 }
 0x130   :  { %v509_v59 = vadd.f32 %v1917_v34, %v508_v51  ;;  %1764 = vmatpush.xpose.msk.msra.mxu2 %vm131_vm0, %v2368_v26  ;;  %v276_v28 = vadd.f32 %v275_v4, %v274_v23  ;;  %v2425_v51 = vld [vmem:[#allocation7 + $0x8] sm:$0xff] }
 0x131   :  { %v479_v2 = vadd.f32 %v1919_v36, %v478_v38  ;;  %1747 = vmatpush.xpose.msk.msra.mxu1 %vm176_vm12, %v2388_v32 }
 0x132   :  { %v513_v3 = vsel %vm512_vm6, %v1917_v34, %v509_v59  ;;  %v2392_v34 = vld [vmem:[#allocation8 + $0x8] sm:$0xff] }
 0x133   :  { %v518_v61 = vsel %vm515_vm8, %v517_v63, %v513_v3  ;;  %v483_v6 = vsel %vm482_vm10, %v1919_v36, %v479_v2  ;;  %v2439_v3 = vperm.slane %v164_v56, 0 }
 0x134   :  { %v519_v29 = vmul.f32 %v518_v61, %v2214_v54  ;;  %v488_v11 = vsel %vm485_vm11, %v487_v9, %v483_v6  ;;  %v2320_v54 = vld [vmem:[%s3153_s5 + $0x10] sm:$0xff]  ;;  %1765 = vmatpush.xpose.msk.msra.mxu2 %vm131_vm0, %v2376_v30 }
 0x135   :  { %v489_v14 = vmul.f32 %v488_v11, %v2217_v55  ;;  %v2357_v55 = vld [vmem:[%s3153_s5 + $0x38] sm:$0xff]  ;;  %1748 = vmatpush.xpose.msk.msra.mxu1 %vm176_vm12, %v2396_v35 }
 0x136   :  { %572 = vmatpush.msrb.mxu3 %v519_v29  ;;  %v2444_v29 = vld [vmem:[#allocation5] sm:$0xff] }
 0x138   :  { %573 = vmatpush.msrb.mxu3 %v504_v12  ;;  %1766 = vmatpush.xpose.msk.msra.mxu2 %vm131_vm0, %v2384_v7 }
 0x139   :  { %1749 = vmatpush.xpose.msk.msra.mxu1 %vm176_vm12, %v2407_v43 }
 0x13a   :  { %574 = vmatpush.msrb.mxu3 %v489_v14  ;;  %v2447_v14 = vld [vmem:[#allocation2] sm:$0xff] }
 0x13b   :  { %1777 = vmatmul.msk.f32.vlgmr.msrb.gmra.mxu3 %vm176_vm12, %v2300_v16 }
 0x13c   :  { %1805 = vmatpush.xpose.msk.msra.mxu3 %vm131_vm0, %v2191_v24  ;;  %v2350_v24 = vld [vmem:[%s3153_s5 + $0x30] sm:$0xff]  ;;  %1767 = vmatpush.xpose.msk.msra.mxu2 %vm131_vm0, %v2392_v34 }
 0x13d   :  { %1750 = vmatpush.xpose.msk.msra.mxu1 %vm176_vm12, %v2422_v49 }
 0x140   :  { %1806 = vmatpush.xpose.msk.msra.mxu3 %vm131_vm0, %v2177_v19  ;;  %v2329_v19 = vld [vmem:[%s3153_s5 + $0x18] sm:$0xff]  ;;  %1768 = vmatpush.xpose.msk.msra.mxu2 %vm131_vm0, %v2405_v41 }
 0x141   :  { %1751 = vmatpush.xpose.msk.msra.mxu1 %vm176_vm12, %v2433_v62 }
 0x143   :  { %1778 = vmatmul.msk.f32.gmra.mxu3 %vm176_vm12, %v2309_v39 }
 0x144   :  { %1807 = vmatpush.xpose.msk.msra.mxu3 %vm131_vm0, %v2172_v17  ;;  %v2336_v17 = vld [vmem:[%s3153_s5 + $0x20] sm:$0xff]  ;;  %1826 = vmatpush.xpose.msk.msrb.mxu2 %vm131_vm0, %v118_v18 }
 0x145   :  { %1752 = vmatpush.xpose.msk.msra.mxu1 %vm176_vm12, %v2444_v29 }
 0x148   :  { %1808 = vmatpush.xpose.msk.msra.mxu3 %vm131_vm0, %v2182_v20  ;;  %v2343_v20 = vld [vmem:[%s3153_s5 + $0x28] sm:$0xff]  ;;  %1827 = vmatpush.xpose.msk.msrb.mxu2 %vm131_vm0, %v117_v22  ;;  %v168_v22 = vmul.f32 %v2439_v3, %v2447_v14 }
 0x149   :  { %1810 = vmatpush.xpose.msk.msrb.mxu1 %vm176_vm12, %v2372_v27 }
 0x14a   :  { %1753 = vmatmul.msk.f32.vlgmr.msra.gmra.mxu1 %vm176_vm12, %v168_v22  ;;  %v2521_v22 = vld [vmem:[#allocation7 + $0x20] sm:$0xff] }
 0x14b   :  { %1779 = vmatmul.msk.f32.gmra.mxu3 %vm176_vm12, %v2320_v54 }
 0x14c   :  { %1828 = vmatpush.xpose.msk.msrb.mxu2 %vm131_vm0, %v116_v25 }
 0x14d   :  { %1811 = vmatpush.xpose.msk.msrb.mxu1 %vm176_vm12, %v2380_v10 }
 0x150   :  { %1829 = vmatpush.xpose.msk.msrb.mxu2 %vm131_vm0, %v2368_v26 }
 0x151   :  { %1812 = vmatpush.xpose.msk.msrb.mxu1 %vm176_vm12, %v2388_v32 }
 0x153   :  { %1780 = vmatmul.msk.f32.gmra.mxu3 %vm176_vm12, %v2329_v19 }
 0x154   :  { %1830 = vmatpush.xpose.msk.msrb.mxu2 %vm131_vm0, %v2376_v30 }
 0x155   :  { %1813 = vmatpush.xpose.msk.msrb.mxu1 %vm176_vm12, %v2396_v35 }
 0x158   :  { %1831 = vmatpush.xpose.msk.msrb.mxu2 %vm131_vm0, %v2384_v7 }
 0x159   :  { %1814 = vmatpush.xpose.msk.msrb.mxu1 %vm176_vm12, %v2407_v43 }
 0x15b   :  { %1781 = vmatmul.msk.f32.gmra.mxu3 %vm176_vm12, %v2336_v17 }
 0x15c   :  { %1832 = vmatpush.xpose.msk.msrb.mxu2 %vm131_vm0, %v2392_v34 }
 0x15d   :  { %1815 = vmatpush.xpose.msk.msrb.mxu1 %vm176_vm12, %v2422_v49 }
 0x160   :  { %1833 = vmatpush.xpose.msk.msrb.mxu2 %vm131_vm0, %v2405_v41 }
 0x161   :  { %1816 = vmatpush.xpose.msk.msrb.mxu1 %vm176_vm12, %v2433_v62  ;;  %v2572_v62 = vld [vmem:[#allocation2 + $0x20] sm:$0xff] }
 0x163   :  { %1782 = vmatmul.msk.f32.gmra.mxu3 %vm176_vm12, %v2343_v20 }
 0x165   :  { %1817 = vmatpush.xpose.msk.msrb.mxu1 %vm176_vm12, %v2444_v29 }
 0x16b   :  { %1783 = vmatmul.msk.f32.gmra.mxu3 %vm176_vm12, %v2350_v24 }
 0x173   :  { %1784 = vmatmul.msk.f32.gmra.mxu3 %vm176_vm12, %v2357_v55 }
 0x17b   :  { %1809 = vmatmul.msk.f32.vlgmr.msra.gmra.mxu3 %vm131_vm0, %v2078_v15  ;;  %v277_v15 = vrot.slane %v276_v28, 1 }
 0x17d   :  { %v278_v33 = vadd.f32 %v277_v15, %v276_v28  ;;  %v2457_v28 = vld [vmem:[#allocation7 + $0x10] sm:$0xff] }
 0x17f   :  { %v2399_v36 = vmul.f32 %v2219_v57, %v278_v33 }
 0x181   :  { %v287_v48 = vmul.f32 %v2399_v36, %v2409_v44  ;;  %v288_v0 = vmul.f32 %v2399_v36, %v2425_v51  ;;  %v289_v26 = vmul.f32 %v2399_v36, %v2457_v28  ;;  %v291_v41 = vmul.f32 %v2399_v36, %v2521_v22 }
 0x183   :  { %1769 = vmatmul.msk.f32.vlgmr.msra.gmra.mxu2 %vm131_vm0, %v287_v48 }
 0x187   :  { %v1068_v31 = vpop.xlane.xlu1 %1067 }
 0x188   :  { %1920 = vrsqrt.f32 %v1068_v31  ;;  %vm1103_vm13 = vcmp.eq.f32.partialorder %v1068_v31, inf  ;;  %v1106_v6 = vand.u32 2147483648, %v1068_v31  ;;  %vm1105_vm14 = vcmp.eq.f32.partialorder %v1068_v31, 0.0 }
 0x18b   :  { %1770 = vmatmul.msk.f32.gmra.mxu2 %vm131_vm0, %v288_v0 }
 0x18e   :  { %v1921_v37 = vpop.eup %1920  ;;  %v2403_v40 = vpop.xlane.xlu0 %1070 }
 0x18f   :  { %v1097_v45 = vmul.f32 %v1921_v37, %v1068_v31  ;;  %1922 = vrsqrt.f32 %v2403_v40  ;;  %v2412_v47 = vpop.xlane.xlu2 %1064  ;;  %vm1115_vm15 = vcmp.eq.f32.partialorder %v2403_v40, inf  ;;  %vm1117_vm1 = vcmp.eq.f32.partialorder %v2403_v40, 0.0 }
 0x190   :  { %1924 = vrsqrt.f32 %v2412_v47  ;;  %v1118_v27 = vand.u32 2147483648, %v2403_v40  ;;  %vm1091_vm2 = vcmp.eq.f32.partialorder %v2412_v47, inf  ;;  %vm1093_vm3 = vcmp.eq.f32.partialorder %v2412_v47, 0.0 }
 0x191   :  { %v1098_v57 = vmul.f32 %v1921_v37, %v1097_v45 }
 0x193   :  { %v1099_v50 = vmul.f32 0.5, %v1098_v57  ;;  %1771 = vmatmul.msk.f32.gmra.mxu2 %vm131_vm0, %v289_v26 }
 0x195   :  { %v1923_v52 = vpop.eup %1922  ;;  %v1100_v53 = vsub.f32 1.5, %v1099_v50  ;;  %v1094_v50 = vand.u32 2147483648, %v2412_v47 }
 0x196   :  { %v1925_v38 = vpop.eup %1924  ;;  %v1109_v58 = vmul.f32 %v1923_v52, %v2403_v40  ;;  %v2431_v59 = vpop.xlane.xlu0 %1061 }
 0x197   :  { %v1101_v1 = vmul.f32 %v1921_v37, %v1100_v53  ;;  %v1085_v63 = vmul.f32 %v1925_v38, %v2412_v47  ;;  %1926 = vrsqrt.f32 %v2431_v59  ;;  %v2476_v53 = vld [vmem:[#allocation2 + $0x8] sm:$0xff]  ;;  %vm1079_vm4 = vcmp.eq.f32.partialorder %v2431_v59, inf }
 0x198   :  { %v1110_v2 = vmul.f32 %v1923_v52, %v1109_v58  ;;  %vm1081_vm5 = vcmp.eq.f32.partialorder %v2431_v59, 0.0 }
 0x199   :  { %v1102_v61 = vmul.f32 %v1101_v1, %v1068_v31  ;;  %v1086_v5 = vmul.f32 %v1925_v38, %v1085_v63  ;;  %v169_v1 = vmul.f32 %v2439_v3, %v2476_v53  ;;  %v2487_v63 = vld [vmem:[#allocation7 + $0x18] sm:$0xff] }
 0x19a   :  { %v1111_v9 = vmul.f32 0.5, %v1110_v2 }
 0x19b   :  { %v1104_v11 = vsel %vm1103_vm13, %v1068_v31, %v1102_v61  ;;  %v1087_v12 = vmul.f32 0.5, %v1086_v5  ;;  %v290_v61 = vmul.f32 %v2399_v36, %v2487_v63  ;;  %1754 = vmatmul.msk.f32.gmra.mxu1 %vm176_vm12, %v169_v1  ;;  %v1082_v5 = vand.u32 2147483648, %v2431_v59 }
 0x19c   :  { %v1107_v18 = vsel %vm1105_vm14, %v1106_v6, %v1104_v11  ;;  %v1112_v21 = vsub.f32 1.5, %v1111_v9  ;;  %v2511_v9 = vld [vmem:[#allocation2 + $0x10] sm:$0xff] }
 0x19d   :  { %v1927_v23 = vpop.eup %1926  ;;  %v2453_v25 = vadd.f32 1e-08, %v1107_v18  ;;  %v1088_v4 = vsub.f32 1.5, %v1087_v12  ;;  %1772 = vmatmul.msk.f32.gmra.mxu2 %vm131_vm0, %v290_v61 }
 0x19e   :  { %v1113_v15 = vmul.f32 %v1923_v52, %v1112_v21  ;;  %v1073_v31 = vmul.f32 %v1927_v23, %v2431_v59  ;;  %v170_v21 = vmul.f32 %v2439_v3, %v2511_v9 }
 0x19f   :  { %1928 = vrcp.f32 %v2453_v25  ;;  %v1089_v33 = vmul.f32 %v1925_v38, %v1088_v4  ;;  %v1165_v35 = vand.u32 2147483648, %v2453_v25  ;;  %vm1159_vm7 = vweird.f32 %v2453_v25 }
 0x1a0   :  { %v1114_v37 = vmul.f32 %v1113_v15, %v2403_v40  ;;  %v1074_v45 = vmul.f32 %v1927_v23, %v1073_v31  ;;  %v1163_v43 = vand.u32 2147483647, %v2453_v25 }
 0x1a1   :  { %v1090_v57 = vmul.f32 %v1089_v33, %v2412_v47 }
 0x1a2   :  { %v1116_v48 = vsel %vm1115_vm15, %v2403_v40, %v1114_v37  ;;  %v1075_v52 = vmul.f32 0.5, %v1074_v45 }
 0x1a3   :  { %v1119_v30 = vsel %vm1117_vm1, %v1118_v27, %v1116_v48  ;;  %v1092_v56 = vsel %vm1091_vm2, %v2412_v47, %v1090_v57  ;;  %1755 = vmatmul.msk.f32.gmra.mxu1 %vm176_vm12, %v170_v21  ;;  %v1166_v57 = vor.u32 1.1754944e-38, %v1165_v35  ;;  %vm1164_vm1 = vcmp.eq.f32.partialorder %v1163_v43, 8.507059e+37 }
 0x1a4   :  { %v2483_v38 = vadd.f32 1e-08, %v1119_v30  ;;  %v1095_v40 = vsel %vm1093_vm3, %v1094_v50, %v1092_v56  ;;  %v1076_v58 = vsub.f32 1.5, %v1075_v52  ;;  %v2545_v52 = vld [vmem:[#allocation2 + $0x18] sm:$0xff]  ;;  %v967_v27 = vmul.f32 %v2226_v60, %v2409_v44 }
 0x1a5   :  { %v2491_v10 = vpop.eup %1928  ;;  %v2493_v0 = vadd.f32 1e-08, %v1095_v40  ;;  %1773 = vmatmul.msk.f32.gmra.mxu2 %vm131_vm0, %v291_v41  ;;  %v171_v49 = vmul.f32 %v2439_v3, %v2545_v52 }
 0x1a6   :  { %1930 = vrcp.f32 %v2483_v38  ;;  %v1077_v47 = vmul.f32 %v1927_v23, %v1076_v58  ;;  %v1155_v2 = vmul.f32 %v2491_v10, %v2453_v25  ;;  %vm1160_vm6 = vweird.f32 %v2491_v10 }
 0x1a7   :  { %1932 = vrcp.f32 %v2493_v0  ;;  %v1180_v33 = vand.u32 2147483648, %v2483_v38  ;;  %v1178_v45 = vand.u32 2147483647, %v2483_v38  ;;  %vm2540_vm9 = vmor %vm1159_vm7, %vm1160_vm6  ;;  %v1150_v50 = vand.u32 2147483648, %v2493_v0 }
 0x1a8   :  { %v1078_v7 = vmul.f32 %v1077_v47, %v2431_v59  ;;  %v1156_v32 = vsub.f32 1.0, %v1155_v2  ;;  %vm1174_vm11 = vweird.f32 %v2483_v38  ;;  %v1148_v56 = vand.u32 2147483647, %v2493_v0  ;;  %v2559_v47 = vld [vmem:[#allocation7 + $0x28] sm:$0xff] }
 0x1a9   :  { %v1181_v58 = vor.u32 1.1754944e-38, %v1180_v33  ;;  %vm1144_vm14 = vweird.f32 %v2493_v0  ;;  %vm1179_vm15 = vcmp.eq.f32.partialorder %v1178_v45, 8.507059e+37  ;;  %v2601_v45 = vld [vmem:[#allocation2 + $0x30] sm:$0xff] }
 0x1aa   :  { %v1080_v6 = vsel %vm1079_vm4, %v2431_v59, %v1078_v7  ;;  %v1157_v12 = vmul.f32 %v2491_v10, %v1156_v32  ;;  %vm1149_vm3 = vcmp.eq.f32.partialorder %v1148_v56, 8.507059e+37 }
 0x1ab   :  { %v1083_v11 = vsel %vm1081_vm5, %v1082_v5, %v1080_v6  ;;  %v1151_v5 = vor.u32 1.1754944e-38, %v1150_v50  ;;  %v292_v6 = vmul.f32 %v2399_v36, %v2559_v47  ;;  %1756 = vmatmul.msk.f32.gmra.mxu1 %vm176_vm12, %v171_v49 }
 0x1ac   :  { %v1931_v34 = vpop.eup %1930  ;;  %v2517_v18 = vadd.f32 1e-08, %v1083_v11  ;;  %v1158_v31 = vadd.f32 %v2491_v10, %v1157_v12 }
 0x1ad   :  { %v1933_v59 = vpop.eup %1932  ;;  %v1170_v23 = vmul.f32 %v1931_v34, %v2483_v38  ;;  %vm1175_vm8 = vweird.f32 %v1931_v34  ;;  %1774 = vmatmul.msk.f32.gmra.mxu2 %vm131_vm0, %v292_v6 }
 0x1ae   :  { %1934 = vrcp.f32 %v2517_v18  ;;  %v1140_v4 = vmul.f32 %v1933_v59, %v2493_v0  ;;  %vm1145_vm10 = vweird.f32 %v1933_v59  ;;  %v1162_v25 = vsel %vm2540_vm9, %v2491_v10, %v1158_v31  ;;  %vm1176_vm13 = vmor %vm1174_vm11, %vm1175_vm8 }
 0x1af   :  { %v1171_v15 = vsub.f32 1.0, %v1170_v23  ;;  %vm1146_vm2 = vmor %vm1144_vm14, %vm1145_vm10  ;;  %v1167_v61 = vsel %vm1164_vm1, %v1166_v57, %v1162_v25  ;;  %v1135_v12 = vand.u32 2147483648, %v2517_v18  ;;  %vm1129_vm5 = vweird.f32 %v2517_v18 }
 0x1b0   :  { %v1141_v26 = vsub.f32 1.0, %v1140_v4  ;;  %v2581_v4 = vld [vmem:[#allocation7 + $0x30] sm:$0xff]  ;;  %vm665_vm8 = vcmask 523264  }
 0x1b1   :  { %v1172_v37 = vmul.f32 %v1931_v34, %v1171_v15  ;;  %v1136_v35 = vor.u32 1.1754944e-38, %v1135_v12 }
 0x1b2   :  { %v1142_v48 = vmul.f32 %v1933_v59, %v1141_v26  ;;  %v2594_v26 = vld [vmem:[#allocation7 + $0x38] sm:$0xff] }
 0x1b3   :  { %v1173_v30 = vadd.f32 %v1931_v34, %v1172_v37  ;;  %v974_v56 = vmul.f32 %v2226_v60, %v2594_v26 }
 0x1b4   :  { %v1935_v40 = vpop.eup %1934  ;;  %v1143_v1 = vadd.f32 %v1933_v59, %v1142_v48 }
 0x1b5   :  { %v1177_v38 = vsel %vm1176_vm13, %v1931_v34, %v1173_v30  ;;  %v1125_v10 = vmul.f32 %v1935_v40, %v2517_v18  ;;  %v1168_v34 = vmul.f32 %v1167_v61, %v2238_v13  ;;  %vm1130_vm4 = vweird.f32 %v1935_v40 }
 0x1b6   :  { %v1182_v2 = vsel %vm1179_vm15, %v1181_v58, %v1177_v38  ;;  %v1147_v7 = vsel %vm1146_vm2, %v1933_v59, %v1143_v1  ;;  %v1133_v59 = vand.u32 2147483647, %v2517_v18  ;;  %vm1131_vm6 = vmor %vm1129_vm5, %vm1130_vm4  ;;  %v172_v13 = vmul.f32 %v2439_v3, %v2572_v62  ;;  %v2589_v18 = vld [vmem:[#allocation2 + $0x28] sm:$0xff] }
 0x1b7   :  { %v1183_v0 = vmul.f32 %v1182_v2, %v2250_v42  ;;  %v1126_v32 = vsub.f32 1.0, %v1125_v10  ;;  %v1152_v11 = vsel %vm1149_vm3, %v1151_v5, %v1147_v7  ;;  %v173_v33 = vmul.f32 %v2439_v3, %v2589_v18 }
 0x1b8   :  { %v1153_v42 = vmul.f32 %v1152_v11, %v2254_v46  ;;  %vm1134_vm7 = vcmp.eq.f32.partialorder %v1133_v59, 8.507059e+37  ;;  %v293_v46 = vmul.f32 %v2399_v36, %v2581_v4  ;;  %1757 = vmatmul.msk.f32.gmra.mxu1 %vm176_vm12, %v172_v13 }
 0x1b9   :  { %1196 = vmatpush.msrb.mxu3 %v1183_v0  ;;  %v1127_v21 = vmul.f32 %v1935_v40, %v1126_v32 }
 0x1ba   :  { %1775 = vmatmul.msk.f32.gmra.mxu2 %vm131_vm0, %v293_v46 }
 0x1bb   :  { %1197 = vmatpush.msrb.mxu3 %v1168_v34  ;;  %v1128_v23 = vadd.f32 %v1935_v40, %v1127_v21 }
 0x1bd   :  { %1198 = vmatpush.msrb.mxu3 %v1153_v42  ;;  %v1132_v15 = vsel %vm1131_vm6, %v1935_v40, %v1128_v23 }
 0x1be   :  { %v576_v31 = vpop.f32.mrf.mxu3  ;;  %v1137_v29 = vsel %vm1134_vm7, %v1136_v35, %v1132_v15 }
 0x1bf   :  { %v1138_v41 = vmul.f32 %v1137_v29, %v2272_v8  ;;  %v294_v8 = vmul.f32 %v2399_v36, %v2594_v26  ;;  %v2611_v36 = vld [vmem:[#allocation2 + $0x38] sm:$0xff] }
 0x1c0   :  { %1758 = vmatmul.msk.f32.gmra.mxu1 %vm176_vm12, %v173_v33 }
 0x1c1   :  { %1199 = vmatpush.msrb.mxu3 %v1138_v41 }
 0x1c2   :  { %1842 = vmatmul.msk.f32.vlgmr.msrb.gmra.mxu3 %vm176_vm12, %v2300_v16  ;;  %1776 = vmatmul.msk.f32.gmra.mxu2 %vm131_vm0, %v294_v8  ;;  %v174_v16 = vmul.f32 %v2439_v3, %v2601_v45 }
 0x1c6   :  { %v579_v37 = vpop.f32.mrf.mxu3 }
 0x1c8   :  { %1759 = vmatmul.msk.f32.gmra.mxu1 %vm176_vm12, %v174_v16 }
 0x1ca   :  { %1843 = vmatmul.msk.f32.gmra.mxu3 %vm176_vm12, %v2309_v39  ;;  %1834 = vmatmul.msk.f32.vlgmr.msrb.gmra.mxu2 %vm131_vm0, %v967_v27  ;;  %v175_v39 = vmul.f32 %v2439_v3, %v2611_v36  ;;  %v968_v3 = vmul.f32 %v2226_v60, %v2425_v51 }
 0x1ce   :  { %v582_v43 = vpop.f32.mrf.mxu3 }
 0x1d0   :  { %1760 = vmatmul.msk.f32.gmra.mxu1 %vm176_vm12, %v175_v39 }
 0x1d2   :  { %1844 = vmatmul.msk.f32.gmra.mxu3 %vm176_vm12, %v2320_v54  ;;  %1835 = vmatmul.msk.f32.gmra.mxu2 %vm131_vm0, %v968_v3 }
 0x1d6   :  { %v585_v57 = vpop.f32.mrf.mxu3 }
 0x1da   :  { %1845 = vmatmul.msk.f32.gmra.mxu3 %vm176_vm12, %v2329_v19 }
 0x1de   :  { %v2619_v48 = vpop.f32.mrf.mxu3 }
 0x1e2   :  { %1846 = vmatmul.msk.f32.gmra.mxu3 %vm176_vm12, %v2336_v17  ;;  %v969_v17 = vmul.f32 %v2226_v60, %v2457_v28 }
 0x1e4   :  { %1836 = vmatmul.msk.f32.gmra.mxu2 %vm131_vm0, %v969_v17 }
 0x1e6   :  { %v2623_v44 = vpop.f32.mrf.mxu3 }
 0x1ea   :  { %1847 = vmatmul.msk.f32.gmra.mxu3 %vm176_vm12, %v2343_v20 }
 0x1ee   :  { %v2627_v54 = vpop.f32.mrf.mxu3 }
 0x1f2   :  { %1848 = vmatmul.msk.f32.gmra.mxu3 %vm176_vm12, %v2350_v24  ;;  %v970_v24 = vmul.f32 %v2226_v60, %v2487_v63 }
 0x1f4   :  { %1837 = vmatmul.msk.f32.gmra.mxu2 %vm131_vm0, %v970_v24 }
 0x1f6   :  { %v2634_v19 = vpop.f32.mrf.mxu3 }
 0x1f7   :  { %1785 = vmatpush.xpose.msk.msra.mxu0 %vm131_vm0, %v2634_v19 }
 0x1fa   :  { %1849 = vmatmul.msk.f32.gmra.mxu3 %vm176_vm12, %v2357_v55  ;;  %v971_v55 = vmul.f32 %v2226_v60, %v2521_v22  ;;  %v973_v22 = vmul.f32 %v2226_v60, %v2581_v4 }
 0x1fb   :  { %1786 = vmatpush.xpose.msk.msra.mxu0 %vm131_vm0, %v2627_v54 }
 0x1fc   :  { %1838 = vmatmul.msk.f32.gmra.mxu2 %vm131_vm0, %v971_v55 }
 0x1fe   :  { %v876_v20 = vpop.f32.mrf.mxu3 }
 0x1ff   :  { %1787 = vmatpush.xpose.msk.msra.mxu0 %vm131_vm0, %v2623_v44  ;;  %v879_v51 = vperm.slane %v876_v20, 0 }
 0x201   :  { %v880_v28 = vmul.f32 %v879_v51, %v2447_v14  ;;  %v881_v63 = vmul.f32 %v879_v51, %v2476_v53  ;;  %v972_v14 = vmul.f32 %v2226_v60, %v2559_v47  ;;  %v882_v50 = vmul.f32 %v879_v51, %v2511_v9  ;;  %v242_v9 = vpop.f32.mrf.mxu1 }
 0x202   :  { %v883_v30 = vmul.f32 %v879_v51, %v2545_v52  ;;  %666 = vst.msk [vmem:[#allocation10] sm:$0xff] %vm665_vm8, %v242_v9  ;;  %v884_v40 = vmul.f32 %v879_v51, %v2572_v62  ;;  %v885_v1 = vmul.f32 %v879_v51, %v2589_v18  ;;  %v886_v47 = vmul.f32 %v879_v51, %v2601_v45 }
 0x203   :  { %1788 = vmatpush.xpose.msk.msra.mxu0 %vm131_vm0, %v2619_v48  ;;  %1818 = vmatmul.msk.f32.vlgmr.msrb.gmra.mxu1 %vm176_vm12, %v880_v28  ;;  %v887_v61 = vmul.f32 %v879_v51, %v2611_v36  ;;  %v674_v18 = vsel %vm665_vm8, %v242_v9, inf  ;;  %v699_v33 = vsel %vm665_vm8, %v242_v9, -inf }
 0x204   :  { %1839 = vmatmul.msk.f32.gmra.mxu2 %vm131_vm0, %v972_v14 }
 0x206   :  { %v360_v53 = vpop.f32.mrf.mxu2 }
 0x207   :  { %1789 = vmatpush.xpose.msk.msra.mxu0 %vm131_vm0, %v585_v57  ;;  %725 = vst.msk [vmem:[#allocation10 + $0x40] sm:$0xff] %vm665_vm8, %v360_v53  ;;  %v2697_v38 = vsel %vm665_vm8, %v360_v53, inf  ;;  %v758_v35 = vsel %vm665_vm8, %v360_v53, -inf }
 0x20b   :  { %1790 = vmatpush.xpose.msk.msra.mxu0 %vm131_vm0, %v582_v43  ;;  %1819 = vmatmul.msk.f32.gmra.mxu1 %vm176_vm12, %v881_v63 }
 0x20c   :  { %1840 = vmatmul.msk.f32.gmra.mxu2 %vm131_vm0, %v973_v22 }
 0x20e   :  { %v363_v25 = vpop.f32.mrf.mxu2 }
 0x20f   :  { %1791 = vmatpush.xpose.msk.msra.mxu0 %vm131_vm0, %v579_v37  ;;  %726 = vst.msk [vmem:[#allocation10 + $0x48] sm:$0xff] %vm665_vm8, %v363_v25  ;;  %v2714_v0 = vsel %vm665_vm8, %v363_v25, inf  ;;  %v759_v13 = vsel %vm665_vm8, %v363_v25, -inf }
 0x213   :  { %1792 = vmatpush.xpose.msk.msra.mxu0 %vm131_vm0, %v576_v31  ;;  %1820 = vmatmul.msk.f32.gmra.mxu1 %vm176_vm12, %v882_v50 }
 0x214   :  { %1841 = vmatmul.msk.f32.gmra.mxu2 %vm131_vm0, %v974_v56 }
 0x216   :  { %1793 = vmatmul.msk.f32.vlgmr.msra.gmra.mxu0 %vm131_vm0, %v576_v31  ;;  %v366_v58 = vpop.f32.mrf.mxu2 }
 0x217   :  { %727 = vst.msk [vmem:[#allocation10 + $0x50] sm:$0xff] %vm665_vm8, %v366_v58  ;;  %v2726_v34 = vsel %vm665_vm8, %v366_v58, inf  ;;  %v760_v31 = vsel %vm665_vm8, %v366_v58, -inf }
 0x218   :  { %v245_v52 = vpop.f32.mrf.mxu1 }
 0x219   :  { %667 = vst.msk [vmem:[#allocation10 + $0x8] sm:$0xff] %vm665_vm8, %v245_v52  ;;  %v675_v16 = vsel %vm665_vm8, %v245_v52, inf }
 0x21b   :  { %1821 = vmatmul.msk.f32.gmra.mxu1 %vm176_vm12, %v883_v30 }
 0x21e   :  { %1794 = vmatmul.msk.f32.gmra.mxu0 %vm131_vm0, %v579_v37 }
 0x220   :  { %v2688_v60 = vpop.f32.mrf.mxu1  ;;  %v369_v49 = vpop.f32.mrf.mxu2 }
 0x221   :  { %668 = vst.msk [vmem:[#allocation10 + $0x10] sm:$0xff] %vm665_vm8, %v2688_v60  ;;  %v2748_v26 = vsel %vm665_vm8, %v369_v49, inf  ;;  %v761_v37 = vsel %vm665_vm8, %v369_v49, -inf  ;;  %v676_v24 = vsel %vm665_vm8, %v2688_v60, inf  ;;  %v701_v51 = vsel %vm665_vm8, %v2688_v60, -inf }
 0x222   :  { %728 = vst.msk [vmem:[#allocation10 + $0x58] sm:$0xff] %vm665_vm8, %v369_v49 }
 0x223   :  { %1822 = vmatmul.msk.f32.gmra.mxu1 %vm176_vm12, %v884_v40 }
 0x226   :  { %1795 = vmatmul.msk.f32.gmra.mxu0 %vm131_vm0, %v582_v43  ;;  %v700_v43 = vsel %vm665_vm8, %v245_v52, -inf }
 0x228   :  { %v2699_v10 = vpop.f32.mrf.mxu1  ;;  %v372_v2 = vpop.f32.mrf.mxu2 }
 0x229   :  { %669 = vst.msk [vmem:[#allocation10 + $0x18] sm:$0xff] %vm665_vm8, %v2699_v10  ;;  %v2708_v7 = vsel %vm665_vm8, %v372_v2, inf  ;;  %v762_v4 = vsel %vm665_vm8, %v372_v2, -inf  ;;  %v677_v30 = vsel %vm665_vm8, %v2699_v10, inf  ;;  %v702_v9 = vsel %vm665_vm8, %v2699_v10, -inf }
 0x22a   :  { %729 = vst.msk [vmem:[#allocation10 + $0x60] sm:$0xff] %vm665_vm8, %v372_v2  ;;  %v738_v5 = vmin.f32 %v2697_v38, %v2708_v7  ;;  %v763_v41 = vmax.f32 %v758_v35, %v762_v4 }
 0x22b   :  { %1823 = vmatmul.msk.f32.gmra.mxu1 %vm176_vm12, %v885_v1 }
 0x22e   :  { %1796 = vmatmul.msk.f32.gmra.mxu0 %vm131_vm0, %v585_v57 }
 0x230   :  { %v375_v6 = vpop.f32.mrf.mxu2 }
 0x231   :  { %730 = vst.msk [vmem:[#allocation10 + $0x68] sm:$0xff] %vm665_vm8, %v375_v6  ;;  %v2721_v11 = vsel %vm665_vm8, %v375_v6, inf  ;;  %v764_v15 = vsel %vm665_vm8, %v375_v6, -inf }
 0x232   :  { %v740_v12 = vmin.f32 %v2714_v0, %v2721_v11  ;;  %v765_v46 = vmax.f32 %v759_v13, %v764_v15 }
 0x233   :  { %1824 = vmatmul.msk.f32.gmra.mxu1 %vm176_vm12, %v886_v47 }
 0x234   :  { %v770_v20 = vmax.f32 %v763_v41, %v765_v46 }
 0x235   :  { %v254_v32 = vpop.f32.mrf.mxu1 }
 0x236   :  { %1797 = vmatmul.msk.f32.gmra.mxu0 %vm131_vm0, %v2619_v48  ;;  %670 = vst.msk [vmem:[#allocation10 + $0x20] sm:$0xff] %vm665_vm8, %v254_v32  ;;  %v678_v27 = vsel %vm665_vm8, %v254_v32, inf  ;;  %v703_v57 = vsel %vm665_vm8, %v254_v32, -inf }
 0x237   :  { %v679_v14 = vmin.f32 %v674_v18, %v678_v27  ;;  %v704_v50 = vmax.f32 %v699_v33, %v703_v57 }
 0x23b   :  { %1825 = vmatmul.msk.f32.gmra.mxu1 %vm176_vm12, %v887_v61 }
 0x23d   :  { %v257_v59 = vpop.f32.mrf.mxu1  ;;  %v378_v62 = vpop.f32.mrf.mxu2 }
 0x23e   :  { %1798 = vmatmul.msk.f32.gmra.mxu0 %vm131_vm0, %v2623_v44  ;;  %671 = vst.msk [vmem:[#allocation10 + $0x28] sm:$0xff] %vm665_vm8, %v257_v59  ;;  %v2735_v42 = vsel %vm665_vm8, %v378_v62, inf  ;;  %v766_v29 = vsel %vm665_vm8, %v378_v62, -inf  ;;  %v680_v48 = vsel %vm665_vm8, %v257_v59, inf  ;;  %v705_v3 = vsel %vm665_vm8, %v257_v59, -inf }
 0x23f   :  { %731 = vst.msk [vmem:[#allocation10 + $0x70] sm:$0xff] %vm665_vm8, %v378_v62  ;;  %v742_v23 = vmin.f32 %v2726_v34, %v2735_v42  ;;  %v767_v36 = vmax.f32 %v760_v31, %v766_v29  ;;  %v681_v53 = vmin.f32 %v675_v16, %v680_v48  ;;  %v706_v22 = vmax.f32 %v700_v43, %v705_v3 }
 0x241   :  { %v711_v2 = vmax.f32 %v704_v50, %v706_v22  ;;  %v686_v61 = vmin.f32 %v679_v14, %v681_v53 }
 0x245   :  { %v2728_v21 = vpop.f32.mrf.mxu3  ;;  %v260_v45 = vpop.f32.mrf.mxu1 }
 0x246   :  { %1799 = vmatmul.msk.f32.gmra.mxu0 %vm131_vm0, %v2627_v54  ;;  %672 = vst.msk [vmem:[#allocation10 + $0x30] sm:$0xff] %vm665_vm8, %v260_v45  ;;  %v381_v39 = vpop.f32.mrf.mxu2  ;;  %v682_v28 = vsel %vm665_vm8, %v260_v45, inf  ;;  %v707_v55 = vsel %vm665_vm8, %v260_v45, -inf }
 0x247   :  { %732 = vst.msk [vmem:[#allocation10 + $0x78] sm:$0xff] %vm665_vm8, %v381_v39  ;;  %v2763_v44 = vsel %vm665_vm8, %v381_v39, inf  ;;  %v768_v54 = vsel %vm665_vm8, %v381_v39, -inf  ;;  %v683_v40 = vmin.f32 %v676_v24, %v682_v28  ;;  %v708_v52 = vmax.f32 %v701_v51, %v707_v55 }
 0x248   :  { %v769_v17 = vmax.f32 %v761_v37, %v768_v54 }
 0x24a   :  { %v771_v63 = vmax.f32 %v767_v36, %v769_v17  ;;  %v745_v17 = vmin.f32 %v738_v5, %v740_v12 }
 0x24c   :  { %v772_v25 = vmax.f32 %v770_v20, %v771_v63 }
 0x24d   :  { %v2751_v8 = vpop.f32.mrf.mxu3  ;;  %v263_v58 = vpop.f32.mrf.mxu1 }
 0x24e   :  { %1800 = vmatmul.msk.f32.gmra.mxu0 %vm131_vm0, %v2634_v19  ;;  %v744_v19 = vmin.f32 %v2748_v26, %v2763_v44  ;;  %773 = vmax.xlane.f32.xlu1 %v772_v25  ;;  %673 = vst.msk [vmem:[#allocation10 + $0x38] sm:$0xff] %vm665_vm8, %v263_v58  ;;  %v684_v1 = vsel %vm665_vm8, %v263_v58, inf  ;;  %v709_v60 = vsel %vm665_vm8, %v263_v58, -inf  ;;  %v1016_v4 = vpop.f32.mrf.mxu2 }
 0x24f   :  { %v685_v49 = vmin.f32 %v677_v30, %v684_v1  ;;  %v710_v47 = vmax.f32 %v702_v9, %v709_v60  ;;  %1350 = vst.msk [vmem:[#allocation10 + $0x100] sm:$0xff] %vm665_vm8, %v1016_v4  ;;  %v1358_v48 = vsel %vm665_vm8, %v1016_v4, inf }
 0x251   :  { %v712_v32 = vmax.f32 %v708_v52, %v710_v47  ;;  %v687_v6 = vmin.f32 %v683_v40, %v685_v49 }
 0x253   :  { %v713_v10 = vmax.f32 %v711_v2, %v712_v32  ;;  %v688_v59 = vmin.f32 %v686_v61, %v687_v6 }
 0x255   :  { %v2779_v56 = vpop.f32.mrf.mxu3  ;;  %714 = vmax.xlane.f32.xlu2 %v713_v10 }
 0x256   :  { %689 = vmin.xlane.f32.xlu1 %v688_v59  ;;  %v1019_v31 = vpop.f32.mrf.mxu2 }
 0x257   :  { %1351 = vst.msk [vmem:[#allocation10 + $0x108] sm:$0xff] %vm665_vm8, %v1019_v31  ;;  %v1359_v54 = vsel %vm665_vm8, %v1019_v31, inf }
 0x25d   :  { %v2784_v62 = vpop.f32.mrf.mxu3 }
 0x265   :  { %v2786_v35 = vpop.f32.mrf.mxu3 }
 0x267   :  { %v1022_v41 = vpop.f32.mrf.mxu2 }
 0x268   :  { %1352 = vst.msk [vmem:[#allocation10 + $0x110] sm:$0xff] %vm665_vm8, %v1022_v41  ;;  %v1360_v20 = vsel %vm665_vm8, %v1022_v41, inf  ;;  %v1385_v51 = vsel %vm665_vm8, %v1022_v41, -inf }
 0x26d   :  { %v2788_v13 = vpop.f32.mrf.mxu3 }
 0x275   :  { %v2791_v15 = vpop.f32.mrf.mxu3 }
 0x277   :  { %v1025_v18 = vpop.f32.mrf.mxu2 }
 0x278   :  { %1353 = vst.msk [vmem:[#allocation10 + $0x118] sm:$0xff] %vm665_vm8, %v1025_v18  ;;  %v1361_v7 = vsel %vm665_vm8, %v1025_v18, inf  ;;  %v1386_v28 = vsel %vm665_vm8, %v1025_v18, -inf }
 0x27d   :  { %v2794_v29 = vpop.f32.mrf.mxu3 }
 0x27e   :  { %1850 = vmatpush.xpose.msk.msrb.mxu0 %vm131_vm0, %v2794_v29 }
 0x27f   :  { %v1028_v37 = vpop.f32.mrf.mxu2 }
 0x280   :  { %v2798_v46 = vpop.f32.mrf.mxu1  ;;  %1354 = vst.msk [vmem:[#allocation10 + $0x120] sm:$0xff] %vm665_vm8, %v1028_v37  ;;  %v1362_v24 = vsel %vm665_vm8, %v1028_v37, inf  ;;  %v1387_v50 = vsel %vm665_vm8, %v1028_v37, -inf }
 0x281   :  { %1291 = vst.msk [vmem:[#allocation10 + $0xc0] sm:$0xff] %vm665_vm8, %v2798_v46  ;;  %v1363_v5 = vmin.f32 %v1358_v48, %v1362_v24  ;;  %v1299_v60 = vsel %vm665_vm8, %v2798_v46, inf  ;;  %v1324_v49 = vsel %vm665_vm8, %v2798_v46, -inf }
 0x282   :  { %1851 = vmatpush.xpose.msk.msrb.mxu0 %vm131_vm0, %v2791_v15 }
 0x286   :  { %1852 = vmatpush.xpose.msk.msrb.mxu0 %vm131_vm0, %v2788_v13 }
 0x287   :  { %v1031_v43 = vpop.f32.mrf.mxu2 }
 0x288   :  { %v2807_v33 = vpop.f32.mrf.mxu1  ;;  %1355 = vst.msk [vmem:[#allocation10 + $0x128] sm:$0xff] %vm665_vm8, %v1031_v43  ;;  %v1364_v0 = vsel %vm665_vm8, %v1031_v43, inf  ;;  %v1389_v53 = vsel %vm665_vm8, %v1031_v43, -inf }
 0x289   :  { %1292 = vst.msk [vmem:[#allocation10 + $0xc8] sm:$0xff] %vm665_vm8, %v2807_v33  ;;  %v1365_v12 = vmin.f32 %v1359_v54, %v1364_v0  ;;  %v1300_v47 = vsel %vm665_vm8, %v2807_v33, inf }
 0x28a   :  { %1853 = vmatpush.xpose.msk.msrb.mxu0 %vm131_vm0, %v2786_v35 }
 0x28b   :  { %v1370_v63 = vmin.f32 %v1363_v5, %v1365_v12 }
 0x28e   :  { %1854 = vmatpush.xpose.msk.msrb.mxu0 %vm131_vm0, %v2784_v62 }
 0x28f   :  { %v1034_v39 = vpop.f32.mrf.mxu2 }
 0x290   :  { %v2816_v45 = vpop.f32.mrf.mxu1  ;;  %1356 = vst.msk [vmem:[#allocation10 + $0x130] sm:$0xff] %vm665_vm8, %v1034_v39  ;;  %v1366_v11 = vsel %vm665_vm8, %v1034_v39, inf  ;;  %v1391_v22 = vsel %vm665_vm8, %v1034_v39, -inf }
 0x291   :  { %1293 = vst.msk [vmem:[#allocation10 + $0xd0] sm:$0xff] %vm665_vm8, %v2816_v45  ;;  %v1367_v34 = vmin.f32 %v1360_v20, %v1366_v11  ;;  %v1392_v52 = vmax.f32 %v1385_v51, %v1391_v22  ;;  %v1326_v41 = vsel %vm665_vm8, %v2816_v45, -inf }
 0x292   :  { %1855 = vmatpush.xpose.msk.msrb.mxu0 %vm131_vm0, %v2779_v56 }
 0x293   :  { %v2823_v16 = vpop.f32.mrf.mxu0 }
 0x294   :  { %784 = vst.msk [vmem:[#allocation10 + $0x80] sm:$0xff] %vm665_vm8, %v2823_v16 }
 0x296   :  { %1856 = vmatpush.xpose.msk.msrb.mxu0 %vm131_vm0, %v2751_v8 }
 0x297   :  { %v1037_v42 = vpop.f32.mrf.mxu2 }
 0x298   :  { %v2829_v27 = vpop.f32.mrf.mxu1  ;;  %1357 = vst.msk [vmem:[#allocation10 + $0x138] sm:$0xff] %vm665_vm8, %v1037_v42  ;;  %v1368_v26 = vsel %vm665_vm8, %v1037_v42, inf  ;;  %v1393_v30 = vsel %vm665_vm8, %v1037_v42, -inf }
 0x299   :  { %1294 = vst.msk [vmem:[#allocation10 + $0xd8] sm:$0xff] %vm665_vm8, %v2829_v27  ;;  %v1369_v44 = vmin.f32 %v1361_v7, %v1368_v26  ;;  %v1394_v58 = vmax.f32 %v1386_v28, %v1393_v30  ;;  %v1302_v48 = vsel %vm665_vm8, %v2829_v27, inf  ;;  %v1327_v54 = vsel %vm665_vm8, %v2829_v27, -inf }
 0x29a   :  { %1857 = vmatpush.xpose.msk.msrb.mxu0 %vm131_vm0, %v2728_v21  ;;  %v817_v26 = vsel %vm665_vm8, %v2823_v16, -inf }
 0x29b   :  { %v2836_v36 = vpop.f32.mrf.mxu0  ;;  %v1371_v14 = vmin.f32 %v1367_v34, %v1369_v44 }
 0x29c   :  { %785 = vst.msk [vmem:[#allocation10 + $0x88] sm:$0xff] %vm665_vm8, %v2836_v36 }
 0x29d   :  { %1858 = vmatmul.msk.f32.vlgmr.msrb.gmra.mxu0 %vm131_vm0, %v2728_v21  ;;  %v746_v21 = vmin.f32 %v742_v23, %v744_v19  ;;  %v1383_v19 = vsel %vm665_vm8, %v1016_v4, -inf  ;;  %v1372_v9 = vmin.f32 %v1370_v63, %v1371_v14  ;;  %v1396_v4 = vmax.f32 %v1392_v52, %v1394_v58 }
 0x29e   :  { %v1388_v25 = vmax.f32 %v1383_v19, %v1387_v50  ;;  %v793_v19 = vsel %vm665_vm8, %v2836_v36, inf }
 0x29f   :  { %v747_v38 = vmin.f32 %v745_v17, %v746_v21 }
 0x2a0   :  { %v941_v57 = vpop.f32.mrf.mxu1 }
 0x2a1   :  { %1295 = vst.msk [vmem:[#allocation10 + $0xe0] sm:$0xff] %vm665_vm8, %v941_v57  ;;  %748 = vmin.xlane.f32.xlu0 %v747_v38  ;;  %v1303_v2 = vsel %vm665_vm8, %v941_v57, inf  ;;  %v1328_v61 = vsel %vm665_vm8, %v941_v57, -inf }
 0x2a2   :  { %v1304_v37 = vmin.f32 %v1299_v60, %v1303_v2  ;;  %v1329_v43 = vmax.f32 %v1324_v49, %v1328_v61 }
 0x2a3   :  { %v2846_v3 = vpop.f32.mrf.mxu0 }
 0x2a4   :  { %786 = vst.msk [vmem:[#allocation10 + $0x90] sm:$0xff] %vm665_vm8, %v2846_v3  ;;  %v794_v63 = vsel %vm665_vm8, %v2846_v3, inf }
 0x2a5   :  { %1859 = vmatmul.msk.f32.gmra.mxu0 %vm131_vm0, %v2751_v8  ;;  %v1384_v8 = vsel %vm665_vm8, %v1019_v31, -inf  ;;  %v1301_v31 = vsel %vm665_vm8, %v2816_v45, inf }
 0x2a6   :  { %v1390_v40 = vmax.f32 %v1384_v8, %v1389_v53  ;;  %v818_v8 = vsel %vm665_vm8, %v2836_v36, -inf }
 0x2a8   :  { %v944_v23 = vpop.f32.mrf.mxu1  ;;  %v1395_v59 = vmax.f32 %v1388_v25, %v1390_v40 }
 0x2a9   :  { %1296 = vst.msk [vmem:[#allocation10 + $0xe8] sm:$0xff] %vm665_vm8, %v944_v23  ;;  %1373 = vmin.xlane.f32.xlu0 %v1372_v9  ;;  %v1305_v32 = vsel %vm665_vm8, %v944_v23, inf  ;;  %v1330_v6 = vsel %vm665_vm8, %v944_v23, -inf  ;;  %v792_v23 = vsel %vm665_vm8, %v2823_v16, inf  ;;  %v819_v16 = vsel %vm665_vm8, %v2846_v3, -inf }
 0x2aa   :  { %v1306_v39 = vmin.f32 %v1300_v47, %v1305_v32 }
 0x2ab   :  { %v2876_v55 = vpop.f32.mrf.mxu0 }
 0x2ac   :  { %787 = vst.msk [vmem:[#allocation10 + $0x98] sm:$0xff] %vm665_vm8, %v2876_v55  ;;  %v1311_v38 = vmin.f32 %v1304_v37, %v1306_v39  ;;  %v795_v53 = vsel %vm665_vm8, %v2876_v55, inf  ;;  %v820_v36 = vsel %vm665_vm8, %v2876_v55, -inf }
 0x2ad   :  { %1860 = vmatmul.msk.f32.gmra.mxu0 %vm131_vm0, %v2779_v56  ;;  %v1325_v56 = vsel %vm665_vm8, %v2807_v33, -inf  ;;  %v1397_v33 = vmax.f32 %v1395_v59, %v1396_v4 }
 0x2ae   :  { %v1331_v57 = vmax.f32 %v1325_v56, %v1330_v6 }
 0x2b0   :  { %v947_v1 = vpop.f32.mrf.mxu1  ;;  %v1336_v11 = vmax.f32 %v1329_v43, %v1331_v57 }
 0x2b1   :  { %1297 = vst.msk [vmem:[#allocation10 + $0xf0] sm:$0xff] %vm665_vm8, %v947_v1  ;;  %v1307_v46 = vsel %vm665_vm8, %v947_v1, inf  ;;  %v1332_v18 = vsel %vm665_vm8, %v947_v1, -inf }
 0x2b2   :  { %v1308_v17 = vmin.f32 %v1301_v31, %v1307_v46  ;;  %v1333_v45 = vmax.f32 %v1326_v41, %v1332_v18 }
 0x2b3   :  { %v653_v10 = vpop.f32.mrf.mxu0 }
 0x2b4   :  { %788 = vst.msk [vmem:[#allocation10 + $0xa0] sm:$0xff] %vm665_vm8, %v653_v10  ;;  %v796_v51 = vsel %vm665_vm8, %v653_v10, inf }
 0x2b5   :  { %1861 = vmatmul.msk.f32.gmra.mxu0 %vm131_vm0, %v2784_v62  ;;  %v797_v25 = vmin.f32 %v792_v23, %v796_v51 }
 0x2b8   :  { %v950_v21 = vpop.f32.mrf.mxu1 }
 0x2b9   :  { %1298 = vst.msk [vmem:[#allocation10 + $0xf8] sm:$0xff] %vm665_vm8, %v950_v21  ;;  %v1309_v20 = vsel %vm665_vm8, %v950_v21, inf  ;;  %v1334_v62 = vsel %vm665_vm8, %v950_v21, -inf }
 0x2ba   :  { %v1310_v24 = vmin.f32 %v1302_v48, %v1309_v20  ;;  %v1335_v0 = vmax.f32 %v1327_v54, %v1334_v62 }
 0x2bb   :  { %v656_v7 = vpop.f32.mrf.mxu0 }
 0x2bc   :  { %789 = vst.msk [vmem:[#allocation10 + $0xa8] sm:$0xff] %vm665_vm8, %v656_v7  ;;  %v1337_v5 = vmax.f32 %v1333_v45, %v1335_v0  ;;  %v1312_v12 = vmin.f32 %v1308_v17, %v1310_v24  ;;  %v798_v44 = vsel %vm665_vm8, %v656_v7, inf }
 0x2bd   :  { %1862 = vmatmul.msk.f32.gmra.mxu0 %vm131_vm0, %v2786_v35  ;;  %v823_v35 = vsel %vm665_vm8, %v656_v7, -inf  ;;  %v799_v22 = vmin.f32 %v793_v19, %v798_v44 }
 0x2be   :  { %v1338_v27 = vmax.f32 %v1336_v11, %v1337_v5  ;;  %v1313_v34 = vmin.f32 %v1311_v38, %v1312_v12  ;;  %v824_v30 = vmax.f32 %v818_v8, %v823_v35 }
 0x2bf   :  { %v804_v56 = vmin.f32 %v797_v25, %v799_v22 }
 0x2c0   :  { %1339 = vmax.xlane.f32.xlu2 %v1338_v27  ;;  %1314 = vmin.xlane.f32.xlu1 %v1313_v34 }
 0x2c1   :  { %v774_v28 = vpop.xlane.xlu1 %773 }
 0x2c2   :  { %v775_v17 = vrot.slane %v774_v28, 4 }
 0x2c3   :  { %v659_v42 = vpop.f32.mrf.mxu0 }
 0x2c4   :  { %790 = vst.msk [vmem:[#allocation10 + $0xb0] sm:$0xff] %vm665_vm8, %v659_v42  ;;  %v800_v14 = vsel %vm665_vm8, %v659_v42, inf  ;;  %v825_v50 = vsel %vm665_vm8, %v659_v42, -inf  ;;  %v776_v21 = vmax.f32 %v774_v28, %v775_v17 }
 0x2c5   :  { %1863 = vmatmul.msk.f32.gmra.mxu0 %vm131_vm0, %v2788_v13  ;;  %v821_v13 = vsel %vm665_vm8, %v653_v10, -inf  ;;  %v801_v58 = vmin.f32 %v794_v63, %v800_v14  ;;  %v826_v1 = vmax.f32 %v819_v16, %v825_v50 }
 0x2c6   :  { %v822_v40 = vmax.f32 %v817_v26, %v821_v13 }
 0x2c8   :  { %1398 = vmax.xlane.f32.xlu1 %v1397_v33  ;;  %v829_v47 = vmax.f32 %v822_v40, %v824_v30  ;;  %v715_v61 = vpop.xlane.xlu2 %714 }
 0x2c9   :  { %v716_v10 = vrot.slane %v715_v61, 4  ;;  %v690_v59 = vpop.xlane.xlu1 %689 }
 0x2ca   :  { %v691_v4 = vrot.slane %v690_v59, 4 }
 0x2cb   :  { %v662_v9 = vpop.f32.mrf.mxu0  ;;  %v717_v31 = vmax.f32 %v715_v61, %v716_v10 }
 0x2cc   :  { %791 = vst.msk [vmem:[#allocation10 + $0xb8] sm:$0xff] %vm665_vm8, %v662_v9  ;;  %v802_v52 = vsel %vm665_vm8, %v662_v9, inf  ;;  %v827_v3 = vsel %vm665_vm8, %v662_v9, -inf  ;;  %v692_v41 = vmin.f32 %v690_v59, %v691_v4 }
 0x2cd   :  { %v803_v60 = vmin.f32 %v795_v53, %v802_v52  ;;  %v828_v49 = vmax.f32 %v820_v36, %v827_v3  ;;  %1864 = vmatmul.msk.f32.gmra.mxu0 %vm131_vm0, %v2791_v15  ;;  %v718_v46 = vrot.slane %v717_v31, 2 }
 0x2ce   :  { %v693_v18 = vrot.slane %v692_v41, 2 }
 0x2cf   :  { %v830_v55 = vmax.f32 %v826_v1, %v828_v49  ;;  %v805_v2 = vmin.f32 %v801_v58, %v803_v60  ;;  %v719_v15 = vmax.f32 %v717_v31, %v718_v46 }
 0x2d0   :  { %v694_v33 = vmin.f32 %v692_v41, %v693_v18 }
 0x2d1   :  { %v831_v32 = vmax.f32 %v829_v47, %v830_v55  ;;  %v806_v6 = vmin.f32 %v804_v56, %v805_v2  ;;  %v720_v37 = vrot.slane %v719_v15, 1 }
 0x2d2   :  { %v695_v43 = vrot.slane %v694_v33, 1 }
 0x2d3   :  { %832 = vmax.xlane.f32.xlu0 %v831_v32  ;;  %807 = vmin.xlane.f32.xlu2 %v806_v6  ;;  %v721_v39 = vmax.f32 %v719_v15, %v720_v37 }
 0x2d4   :  { %v696_v57 = vmin.f32 %v694_v33, %v695_v43 }
 0x2d5   :  { %1865 = vmatmul.msk.f32.gmra.mxu0 %vm131_vm0, %v2794_v29  ;;  %v777_v29 = vrot.slane %v776_v21, 2 }
 0x2d6   :  { %1866 = vpush %v696_v57 }
 0x2d7   :  { %1868 = vpush %v721_v39  ;;  %v778_v38 = vmax.f32 %v776_v21, %v777_v29 }
 0x2d9   :  { %v779_v5 = vrot.slane %v778_v38, 1 }
 0x2db   :  { %v780_v27 = vmax.f32 %v778_v38, %v779_v5 }
 0x307   :  { %s1867_s5 = spop %1866 }
 0x308   :  { %s1869_s20 = spop %1868 }
 0x314   :  { %v749_v54 = vpop.xlane.xlu0 %748 }
 0x315   :  { %v750_v45 = vrot.slane %v749_v54, 4 }
 0x317   :  { %v751_v62 = vmin.f32 %v749_v54, %v750_v45 }
 0x319   :  { %v752_v24 = vrot.slane %v751_v62, 2 }
 0x31a   :  { %v1266_v48 = vpop.f32.mrf.mxu0 }
 0x31b   :  { %1409 = vst.msk [vmem:[#allocation10 + $0x140] sm:$0xff] %vm665_vm8, %v1266_v48  ;;  %v753_v11 = vmin.f32 %v751_v62, %v752_v24  ;;  %v1417_v47 = vsel %vm665_vm8, %v1266_v48, inf  ;;  %v1442_v55 = vsel %vm665_vm8, %v1266_v48, -inf }
 0x31c   :  { %v1374_v26 = vpop.xlane.xlu0 %1373 }
 0x31d   :  { %v754_v7 = vrot.slane %v753_v11, 1  ;;  %v1375_v8 = vrot.slane %v1374_v26, 4 }
 0x31f   :  { %v755_v12 = vmin.f32 %v753_v11, %v754_v7  ;;  %v1376_v63 = vmin.f32 %v1374_v26, %v1375_v8 }
 0x321   :  { %1870 = vpush %v755_v12  ;;  %v1377_v36 = vrot.slane %v1376_v63, 2 }
 0x322   :  { %v1269_v20 = vpop.f32.mrf.mxu0  ;;  %1872 = vpush %v780_v27 }
 0x323   :  { %1410 = vst.msk [vmem:[#allocation10 + $0x148] sm:$0xff] %vm665_vm8, %v1269_v20  ;;  %v1378_v49 = vmin.f32 %v1376_v63, %v1377_v36  ;;  %v1418_v61 = vsel %vm665_vm8, %v1269_v20, inf  ;;  %v1443_v32 = vsel %vm665_vm8, %v1269_v20, -inf }
 0x325   :  { %v1379_v33 = vrot.slane %v1378_v49, 1 }
 0x327   :  { %v1380_v7 = vmin.f32 %v1378_v49, %v1379_v33 }
 0x32a   :  { %v1272_v0 = vpop.f32.mrf.mxu0 }
 0x32b   :  { %1411 = vst.msk [vmem:[#allocation10 + $0x150] sm:$0xff] %vm665_vm8, %v1272_v0  ;;  %v1419_v59 = vsel %vm665_vm8, %v1272_v0, inf  ;;  %v1444_v4 = vsel %vm665_vm8, %v1272_v0, -inf }
 0x332   :  { %v1275_v34 = vpop.f32.mrf.mxu0 }
 0x333   :  { %1412 = vst.msk [vmem:[#allocation10 + $0x158] sm:$0xff] %vm665_vm8, %v1275_v34  ;;  %v1315_v42 = vpop.xlane.xlu1 %1314  ;;  %v1340_v44 = vpop.xlane.xlu2 %1339  ;;  %v1420_v46 = vsel %vm665_vm8, %v1275_v34, inf  ;;  %v1445_v48 = vsel %vm665_vm8, %v1275_v34, -inf }
 0x334   :  { %v1316_v19 = vrot.slane %v1315_v42, 4  ;;  %v1341_v51 = vrot.slane %v1340_v44, 4 }
 0x336   :  { %v1317_v28 = vmin.f32 %v1315_v42, %v1316_v19  ;;  %v1342_v14 = vmax.f32 %v1340_v44, %v1341_v51 }
 0x338   :  { %v1318_v53 = vrot.slane %v1317_v28, 2  ;;  %v1343_v40 = vrot.slane %v1342_v14, 2 }
 0x33a   :  { %v1278_v23 = vpop.f32.mrf.mxu0  ;;  %v1319_v60 = vmin.f32 %v1317_v28, %v1318_v53  ;;  %v1344_v10 = vmax.f32 %v1342_v14, %v1343_v40  ;;  %v698_v14 = vstv %s1867_s5  ;;  %v723_v53 = vstv %s1869_s20 }
 0x33b   :  { %1413 = vst.msk [vmem:[#allocation10 + $0x160] sm:$0xff] %vm665_vm8, %v1278_v23  ;;  %v1399_v35 = vpop.xlane.xlu1 %1398  ;;  %v1421_v18 = vsel %vm665_vm8, %v1278_v23, inf  ;;  %v1446_v54 = vsel %vm665_vm8, %v1278_v23, -inf }
 0x33c   :  { %v1400_v13 = vrot.slane %v1399_v35, 4  ;;  %v1320_v15 = vrot.slane %v1319_v60, 1  ;;  %v1345_v17 = vrot.slane %v1344_v10, 1  ;;  %v1422_v24 = vmin.f32 %v1417_v47, %v1421_v18 }
 0x33d   :  { %v1447_v5 = vmax.f32 %v1442_v55, %v1446_v54 }
 0x33e   :  { %v1401_v50 = vmax.f32 %v1399_v35, %v1400_v13  ;;  %v1321_v34 = vmin.f32 %v1319_v60, %v1320_v15  ;;  %v1346_v35 = vmax.f32 %v1344_v10, %v1345_v17 }
 0x340   :  { %v1402_v52 = vrot.slane %v1401_v50, 2 }
 0x342   :  { %v1281_v16 = vpop.f32.mrf.mxu0  ;;  %v1403_v6 = vmax.f32 %v1401_v50, %v1402_v52 }
 0x343   :  { %1414 = vst.msk [vmem:[#allocation10 + $0x168] sm:$0xff] %vm665_vm8, %v1281_v16  ;;  %v1423_v37 = vsel %vm665_vm8, %v1281_v16, inf  ;;  %v1448_v43 = vsel %vm665_vm8, %v1281_v16, -inf }
 0x344   :  { %v1404_v45 = vrot.slane %v1403_v6, 1  ;;  %v1424_v0 = vmin.f32 %v1418_v61, %v1423_v37  ;;  %v1449_v11 = vmax.f32 %v1443_v32, %v1448_v43  ;;  %v1490_v37 = vld [vmem:[#allocation10 + $0x18] sm:$0xff]  ;;  %v1491_v43 = vld [vmem:[#allocation10 + $0x20] sm:$0xff] }
 0x346   :  { %v833_v22 = vpop.xlane.xlu0 %832  ;;  %v808_v30 = vpop.xlane.xlu2 %807  ;;  %v1405_v19 = vmax.f32 %v1403_v6, %v1404_v45  ;;  %v1454_v8 = vmax.f32 %v1447_v5, %v1449_v11  ;;  %v1429_v13 = vmin.f32 %v1422_v24, %v1424_v0  ;;  %v1493_v0 = vld [vmem:[#allocation10 + $0x30] sm:$0xff]  ;;  %v1519_v5 = vld [vmem:[#allocation10 + $0xc0] sm:$0xff] }
 0x347   :  { %v834_v9 = vrot.slane %v833_v22, 4  ;;  %v809_v25 = vrot.slane %v808_v30, 4 }
 0x349   :  { %v835_v3 = vmax.f32 %v833_v22, %v834_v9  ;;  %v810_v58 = vmin.f32 %v808_v30, %v809_v25 }
 0x34a   :  { %v1284_v1 = vpop.f32.mrf.mxu0 }
 0x34b   :  { %v836_v56 = vrot.slane %v835_v3, 2  ;;  %v811_v2 = vrot.slane %v810_v58, 2  ;;  %1415 = vst.msk [vmem:[#allocation10 + $0x170] sm:$0xff] %vm665_vm8, %v1284_v1  ;;  %v1425_v21 = vsel %vm665_vm8, %v1284_v1, inf  ;;  %v1450_v20 = vsel %vm665_vm8, %v1284_v1, -inf }
 0x34c   :  { %v1426_v42 = vmin.f32 %v1419_v59, %v1425_v21  ;;  %v1451_v23 = vmax.f32 %v1444_v4, %v1450_v20  ;;  %v1487_v4 = vld [vmem:[#allocation10] sm:$0xff]  ;;  %v1492_v21 = vld [vmem:[#allocation10 + $0x28] sm:$0xff] }
 0x34d   :  { %v812_v31 = vmin.f32 %v810_v58, %v811_v2  ;;  %v837_v41 = vmax.f32 %v835_v3, %v836_v56 }
 0x34f   :  { %v813_v39 = vrot.slane %v812_v31, 1  ;;  %v838_v57 = vrot.slane %v837_v41, 1 }
 0x351   :  { %v814_v62 = vmin.f32 %v812_v31, %v813_v39  ;;  %v839_v29 = vmax.f32 %v837_v41, %v838_v57  ;;  %v1488_v41 = vld [vmem:[#allocation10 + $0x8] sm:$0xff] }
 0x352   :  { %v1287_v38 = vpop.f32.mrf.mxu0  ;;  %s1871_s21 = spop %1870 }
 0x353   :  { %1416 = vst.msk [vmem:[#allocation10 + $0x178] sm:$0xff] %vm665_vm8, %v1287_v38  ;;  %v1427_v12 = vsel %vm665_vm8, %v1287_v38, inf  ;;  %v1452_v27 = vsel %vm665_vm8, %v1287_v38, -inf  ;;  %s1873_s22 = spop %1872  ;;  %v757_v52 = vstv %s1871_s21 }
 0x354   :  { %v1428_v26 = vmin.f32 %v1420_v46, %v1427_v12  ;;  %v1453_v44 = vmax.f32 %v1445_v48, %v1452_v27  ;;  %1874 = vpush %v814_v62  ;;  %v782_v58 = vstv %s1873_s22  ;;  %v1489_v46 = vld [vmem:[#allocation10 + $0x10] sm:$0xff] }
 0x355   :  { %1876 = vpush %v839_v29 }
 0x356   :  { %1878 = vpush %v1321_v34  ;;  %v1455_v51 = vmax.f32 %v1451_v23, %v1453_v44  ;;  %v1430_v28 = vmin.f32 %v1426_v42, %v1428_v26  ;;  %v1520_v44 = vld [vmem:[#allocation10 + $0xc8] sm:$0xff] }
 0x357   :  { %1880 = vpush %v1346_v35 }
 0x358   :  { %1882 = vpush %v1380_v7  ;;  %v1456_v63 = vmax.f32 %v1454_v8, %v1455_v51  ;;  %v1431_v16 = vmin.f32 %v1429_v13, %v1430_v28  ;;  %v1494_v7 = vld [vmem:[#allocation10 + $0x38] sm:$0xff]  ;;  %v1521_v51 = vld [vmem:[#allocation10 + $0xd0] sm:$0xff] }
 0x359   :  { %1884 = vpush %v1405_v19 }
 0x35a   :  { %1457 = vmax.xlane.f32.xlu0 %v1456_v63  ;;  %1432 = vmin.xlane.f32.xlu2 %v1431_v16  ;;  %v1522_v63 = vld [vmem:[#allocation10 + $0xd8] sm:$0xff] }
 0x385   :  { %s2974_s23 = spop %1874 }
 0x386   :  { %s2976_s24 = spop %1876 }
 0x387   :  { %s1879_s25 = spop %1878 }
 0x388   :  { %v1323_v50 = vstv %s1879_s25  ;;  %s1881_s26 = spop %1880 }
 0x389   :  { %v2978_v36 = vmin.f32 %v698_v14, %v1323_v50  ;;  %v1348_v22 = vstv %s1881_s26  ;;  %s1883_s27 = spop %1882 }
 0x38a   :  { %v1468_v30 = vmax.f32 %v723_v53, %v1348_v22  ;;  %v1382_v25 = vstv %s1883_s27  ;;  %s1885_s28 = spop %1884  ;;  %v1523_v53 = vld [vmem:[#allocation10 + $0xe0] sm:$0xff] }
 0x38b   :  { %v2981_v3 = vmin.f32 %v757_v52, %v1382_v25  ;;  %v1407_v1 = vstv %s1885_s28  ;;  %v1495_v15 = vsub.f32 %v1487_v4, %v2978_v36  ;;  %v1496_v57 = vsub.f32 %v1488_v41, %v2978_v36  ;;  %v1524_v25 = vld [vmem:[#allocation10 + $0xe8] sm:$0xff] }
 0x38c   :  { %v1469_v9 = vsub.f32 %v1468_v30, %v2978_v36  ;;  %v1552_v60 = vmax.f32 %v782_v58, %v1407_v1  ;;  %v1497_v48 = vsub.f32 %v1489_v46, %v2978_v36  ;;  %v1498_v17 = vsub.f32 %v1490_v37, %v2978_v36  ;;  %v1525_v1 = vld [vmem:[#allocation10 + $0xf0] sm:$0xff]  ;;  %v1572_v4 = vld [vmem:[#allocation10 + $0x48] sm:$0xff]  ;;  %v1575_v37 = vld [vmem:[#allocation10 + $0x60] sm:$0xff] }
 0x38d   :  { %v1499_v45 = vsub.f32 %v1491_v43, %v2978_v36  ;;  %v1500_v11 = vsub.f32 %v1492_v21, %v2978_v36  ;;  %v1501_v12 = vsub.f32 %v1493_v0, %v2978_v36  ;;  %v1502_v34 = vsub.f32 %v1494_v7, %v2978_v36  ;;  %v1573_v46 = vld [vmem:[#allocation10 + $0x50] sm:$0xff] }
 0x38e   :  { %v1470_v40 = vadd.f32 1e-08, %v1469_v9  ;;  %v2984_v49 = vsub.f32 %v1552_v60, %v2981_v3  ;;  %vm1485_vm11 = vcmp.lt.f32.partialorder %v1469_v9, 1e-08  ;;  %v1527_v23 = vsub.f32 %v1519_v5, %v2978_v36 }
 0x38f   :  { %v1528_v28 = vsub.f32 %v1520_v44, %v2978_v36  ;;  %v1529_v16 = vsub.f32 %v1521_v51, %v2978_v36  ;;  %v1530_v22 = vsub.f32 %v1522_v63, %v2978_v36  ;;  %v1532_v60 = vsub.f32 %v1524_v25, %v2978_v36  ;;  %v1607_v44 = vld [vmem:[#allocation10 + $0x120] sm:$0xff] }
 0x390   :  { %1936 = vrcp.f32 %v1470_v40  ;;  %v2987_v55 = vadd.f32 1e-08, %v2984_v49  ;;  %v1482_v61 = vand.u32 2147483648, %v1470_v40  ;;  %v1480_v6 = vand.u32 2147483647, %v1470_v40 }
 0x391   :  { %vm1476_vm12 = vweird.f32 %v1470_v40  ;;  %vm1569_vm2 = vcmp.lt.f32.partialorder %v2984_v49, 1e-08  ;;  %v1574_v49 = vld [vmem:[#allocation10 + $0x58] sm:$0xff]  ;;  %v1615_v51 = vsub.f32 %v1607_v44, %v2981_v3 }
 0x392   :  { %1938 = vrcp.f32 %v2987_v55  ;;  %v1483_v31 = vor.u32 1.1754944e-38, %v1482_v61  ;;  %vm1481_vm10 = vcmp.eq.f32.partialorder %v1480_v6, 8.507059e+37  ;;  %v1566_v26 = vand.u32 2147483648, %v2987_v55 }
 0x393   :  { %v1564_v8 = vand.u32 2147483647, %v2987_v55  ;;  %vm1560_vm14 = vweird.f32 %v2987_v55  ;;  %v1582_v43 = vsub.f32 %v1574_v49, %v2981_v3 }
 0x394   :  { %v1567_v9 = vor.u32 1.1754944e-38, %v1566_v26 }
 0x395   :  { %vm1565_vm1 = vcmp.eq.f32.partialorder %v1564_v8, 8.507059e+37  ;;  %v1608_v8 = vld [vmem:[#allocation10 + $0x128] sm:$0xff] }
 0x396   :  { %v1937_v47 = vpop.eup %1936  ;;  %v1616_v63 = vsub.f32 %v1608_v8, %v2981_v3  ;;  %v1691_v8 = vld [vmem:[#allocation10 + $0x160] sm:$0xff] }
 0x397   :  { %v1472_v56 = vmul.f32 %v1937_v47, %v1470_v40  ;;  %vm1477_vm0 = vweird.f32 %v1937_v47  ;;  %v1531_v40 = vsub.f32 %v1523_v53, %v2978_v36 }
 0x398   :  { %v2990_v59 = vpop.eup %1938  ;;  %vm1478_vm9 = vmor %vm1476_vm12, %vm1477_vm0 }
 0x399   :  { %v1473_v2 = vsub.f32 1.0, %v1472_v56  ;;  %v1556_v33 = vmul.f32 %v2990_v59, %v2987_v55  ;;  %vm1561_vm13 = vweird.f32 %v2990_v59  ;;  %v1526_v56 = vld [vmem:[#allocation10 + $0xf8] sm:$0xff] }
 0x39a   :  { %vm1562_vm15 = vmor %vm1560_vm14, %vm1561_vm13  ;;  %v1534_v6 = vsub.f32 %v1526_v56, %v2978_v36 }
 0x39b   :  { %v1474_v32 = vmul.f32 %v1937_v47, %v1473_v2  ;;  %v1557_v24 = vsub.f32 1.0, %v1556_v33  ;;  %v1533_v2 = vsub.f32 %v1525_v1, %v2978_v36  ;;  %v1580_v36 = vsub.f32 %v1572_v4, %v2981_v3 }
 0x39d   :  { %v1475_v10 = vadd.f32 %v1937_v47, %v1474_v32  ;;  %v1558_v19 = vmul.f32 %v2990_v59, %v1557_v24  ;;  %v1571_v32 = vld [vmem:[#allocation10 + $0x40] sm:$0xff] }
 0x39e   :  { %v1579_v41 = vsub.f32 %v1571_v32, %v2981_v3  ;;  %v1603_v24 = vld [vmem:[#allocation10 + $0x100] sm:$0xff] }
 0x39f   :  { %v1479_v18 = vsel %vm1478_vm9, %v1937_v47, %v1475_v10  ;;  %v1559_v50 = vadd.f32 %v2990_v59, %v1558_v19  ;;  %v1611_v5 = vsub.f32 %v1603_v24, %v2981_v3 }
 0x3a0   :  { %v1484_v39 = vsel %vm1481_vm10, %v1483_v31, %v1479_v18 }
 0x3a1   :  { %v2997_v54 = vsel %vm1485_vm11, 0.0, %v1484_v39  ;;  %v1563_v58 = vsel %vm1562_vm15, %v2990_v59, %v1559_v50 }
 0x3a2   :  { %v1503_v20 = vmul.f32 %v1495_v15, %v2997_v54  ;;  %v1504_v62 = vmul.f32 %v1496_v57, %v2997_v54  ;;  %v1505_v29 = vmul.f32 %v1497_v48, %v2997_v54  ;;  %v1506_v38 = vmul.f32 %v1498_v17, %v2997_v54  ;;  %v1576_v57 = vld [vmem:[#allocation10 + $0x68] sm:$0xff]  ;;  %v1577_v17 = vld [vmem:[#allocation10 + $0x70] sm:$0xff] }
 0x3a3   :  { %v1507_v27 = vmul.f32 %v1499_v45, %v2997_v54  ;;  %v1508_v42 = vmul.f32 %v1500_v11, %v2997_v54  ;;  %v1509_v35 = vmul.f32 %v1501_v12, %v2997_v54  ;;  %v1510_v13 = vmul.f32 %v1502_v34, %v2997_v54  ;;  %v1605_v12 = vld [vmem:[#allocation10 + $0x110] sm:$0xff] }
 0x3a4   :  { %1511 = vst.msk [vmem:[#allocation10] sm:$0xff] %vm665_vm8, %v1503_v20  ;;  %v1535_v14 = vmul.f32 %v1527_v23, %v2997_v54  ;;  %v1536_v30 = vmul.f32 %v1528_v28, %v2997_v54  ;;  %v1537_v52 = vmul.f32 %v1529_v16, %v2997_v54  ;;  %v1538_v47 = vmul.f32 %v1530_v22, %v2997_v54  ;;  %v1578_v20 = vld [vmem:[#allocation10 + $0x78] sm:$0xff]  ;;  %v1609_v28 = vld [vmem:[#allocation10 + $0x130] sm:$0xff] }
 0x3a5   :  { %1512 = vst.msk [vmem:[#allocation10 + $0x8] sm:$0xff] %vm665_vm8, %v1504_v62  ;;  %v1568_v55 = vsel %vm1565_vm1, %v1567_v9, %v1563_v58  ;;  %v1539_v61 = vmul.f32 %v1531_v40, %v2997_v54  ;;  %v1540_v10 = vmul.f32 %v1532_v60, %v2997_v54  ;;  %v1541_v31 = vmul.f32 %v1533_v2, %v2997_v54 }
 0x3a6   :  { %1513 = vst.msk [vmem:[#allocation10 + $0x10] sm:$0xff] %vm665_vm8, %v1505_v29  ;;  %v3046_v59 = vsel %vm1569_vm2, 0.0, %v1568_v55  ;;  %v1542_v18 = vmul.f32 %v1534_v6, %v2997_v54  ;;  %v1581_v15 = vsub.f32 %v1573_v46, %v2981_v3  ;;  %v1583_v48 = vsub.f32 %v1575_v37, %v2981_v3 }
 0x3a7   :  { %1514 = vst.msk [vmem:[#allocation10 + $0x18] sm:$0xff] %vm665_vm8, %v1506_v38  ;;  %v1587_v33 = vmul.f32 %v1579_v41, %v3046_v59  ;;  %v1588_v39 = vmul.f32 %v1580_v36, %v3046_v59  ;;  %v1584_v45 = vsub.f32 %v1576_v57, %v2981_v3  ;;  %v1590_v21 = vmul.f32 %v1582_v43, %v3046_v59  ;;  %v1604_v38 = vld [vmem:[#allocation10 + $0x108] sm:$0xff]  ;;  %v1655_v43 = vld [vmem:[#allocation10 + $0x80] sm:$0xff] }
 0x3a8   :  { %1515 = vst.msk [vmem:[#allocation10 + $0x20] sm:$0xff] %vm665_vm8, %v1507_v27  ;;  %v1589_v54 = vmul.f32 %v1581_v15, %v3046_v59  ;;  %v1585_v62 = vsub.f32 %v1577_v17, %v2981_v3  ;;  %v1591_v29 = vmul.f32 %v1583_v48, %v3046_v59  ;;  %v1586_v0 = vsub.f32 %v1578_v20, %v2981_v3  ;;  %v1656_v57 = vld [vmem:[#allocation10 + $0x88] sm:$0xff]  ;;  %v1657_v48 = vld [vmem:[#allocation10 + $0x90] sm:$0xff] }
 0x3a9   :  { %1516 = vst.msk [vmem:[#allocation10 + $0x28] sm:$0xff] %vm665_vm8, %v1508_v42  ;;  %v1592_v11 = vmul.f32 %v1584_v45, %v3046_v59  ;;  %v1612_v34 = vsub.f32 %v1604_v38, %v2981_v3  ;;  %v1606_v42 = vld [vmem:[#allocation10 + $0x118] sm:$0xff]  ;;  %v1613_v23 = vsub.f32 %v1605_v12, %v2981_v3  ;;  %v1619_v26 = vmul.f32 %v1611_v5, %v3046_v59  ;;  %v1660_v20 = vld [vmem:[#allocation10 + $0xa8] sm:$0xff] }
 0x3aa   :  { %1517 = vst.msk [vmem:[#allocation10 + $0x30] sm:$0xff] %vm665_vm8, %v1509_v35  ;;  %v1593_v7 = vmul.f32 %v1585_v62, %v3046_v59  ;;  %v1594_v27 = vmul.f32 %v1586_v0, %v3046_v59  ;;  %v1614_v35 = vsub.f32 %v1606_v42, %v2981_v3  ;;  %v1617_v50 = vsub.f32 %v1609_v28, %v2981_v3  ;;  %v1662_v38 = vld [vmem:[#allocation10 + $0xb8] sm:$0xff]  ;;  %v1689_v42 = vld [vmem:[#allocation10 + $0x150] sm:$0xff] }
 0x3ab   :  { %1518 = vst.msk [vmem:[#allocation10 + $0x38] sm:$0xff] %vm665_vm8, %v1510_v13  ;;  %v1620_v19 = vmul.f32 %v1612_v34, %v3046_v59  ;;  %v1621_v13 = vmul.f32 %v1613_v23, %v3046_v59  ;;  %v1623_v53 = vmul.f32 %v1615_v51, %v3046_v59  ;;  %v1688_v34 = vld [vmem:[#allocation10 + $0x148] sm:$0xff] }
 0x3ac   :  { %1543 = vst.msk [vmem:[#allocation10 + $0xc0] sm:$0xff] %vm665_vm8, %v1535_v14  ;;  %v1622_v16 = vmul.f32 %v1614_v35, %v3046_v59  ;;  %v1610_v14 = vld [vmem:[#allocation10 + $0x138] sm:$0xff]  ;;  %v1625_v9 = vmul.f32 %v1617_v50, %v3046_v59 }
 0x3ad   :  { %1544 = vst.msk [vmem:[#allocation10 + $0xc8] sm:$0xff] %vm665_vm8, %v1536_v30  ;;  %v1618_v22 = vsub.f32 %v1610_v14, %v2981_v3  ;;  %v1624_v30 = vmul.f32 %v1616_v63, %v3046_v59  ;;  %v1692_v63 = vld [vmem:[#allocation10 + $0x168] sm:$0xff]  ;;  %v1694_v14 = vld [vmem:[#allocation10 + $0x178] sm:$0xff] }
 0x3ae   :  { %1545 = vst.msk [vmem:[#allocation10 + $0xd0] sm:$0xff] %vm665_vm8, %v1537_v52 }
 0x3af   :  { %1546 = vst.msk [vmem:[#allocation10 + $0xd8] sm:$0xff] %vm665_vm8, %v1538_v47  ;;  %v1626_v25 = vmul.f32 %v1618_v22, %v3046_v59  ;;  %v816_v59 = vstv %s2974_s23 }
 0x3b0   :  { %1547 = vst.msk [vmem:[#allocation10 + $0xe0] sm:$0xff] %vm665_vm8, %v1539_v61 }
 0x3b1   :  { %1548 = vst.msk [vmem:[#allocation10 + $0xe8] sm:$0xff] %vm665_vm8, %v1540_v10 }
 0x3b2   :  { %1549 = vst.msk [vmem:[#allocation10 + $0xf0] sm:$0xff] %vm665_vm8, %v1541_v31  ;;  %v841_v31 = vstv %s2976_s24 }
 0x3b3   :  { %1550 = vst.msk [vmem:[#allocation10 + $0xf8] sm:$0xff] %vm665_vm8, %v1542_v18 }
 0x3b4   :  { %1595 = vst.msk [vmem:[#allocation10 + $0x40] sm:$0xff] %vm665_vm8, %v1587_v33 }
 0x3b5   :  { %1596 = vst.msk [vmem:[#allocation10 + $0x48] sm:$0xff] %vm665_vm8, %v1588_v39 }
 0x3b6   :  { %1597 = vst.msk [vmem:[#allocation10 + $0x50] sm:$0xff] %vm665_vm8, %v1589_v54  ;;  %v1658_v54 = vld [vmem:[#allocation10 + $0x98] sm:$0xff] }
 0x3b7   :  { %1598 = vst.msk [vmem:[#allocation10 + $0x58] sm:$0xff] %vm665_vm8, %v1590_v21  ;;  %v1659_v21 = vld [vmem:[#allocation10 + $0xa0] sm:$0xff] }
 0x3b8   :  { %1599 = vst.msk [vmem:[#allocation10 + $0x60] sm:$0xff] %vm665_vm8, %v1591_v29 }
 0x3b9   :  { %1600 = vst.msk [vmem:[#allocation10 + $0x68] sm:$0xff] %vm665_vm8, %v1592_v11  ;;  %v1661_v11 = vld [vmem:[#allocation10 + $0xb0] sm:$0xff] }
 0x3ba   :  { %1601 = vst.msk [vmem:[#allocation10 + $0x70] sm:$0xff] %vm665_vm8, %v1593_v7  ;;  %v1687_v7 = vld [vmem:[#allocation10 + $0x140] sm:$0xff] }
 0x3bb   :  { %1602 = vst.msk [vmem:[#allocation10 + $0x78] sm:$0xff] %vm665_vm8, %v1594_v27 }
 0x3bc   :  { %1627 = vst.msk [vmem:[#allocation10 + $0x100] sm:$0xff] %vm665_vm8, %v1619_v26 }
 0x3bd   :  { %1628 = vst.msk [vmem:[#allocation10 + $0x108] sm:$0xff] %vm665_vm8, %v1620_v19  ;;  %v1690_v19 = vld [vmem:[#allocation10 + $0x158] sm:$0xff] }
 0x3be   :  { %1629 = vst.msk [vmem:[#allocation10 + $0x110] sm:$0xff] %vm665_vm8, %v1621_v13 }
 0x3bf   :  { %1630 = vst.msk [vmem:[#allocation10 + $0x118] sm:$0xff] %vm665_vm8, %v1622_v16  ;;  %v1693_v16 = vld [vmem:[#allocation10 + $0x170] sm:$0xff] }
 0x3c0   :  { %1631 = vst.msk [vmem:[#allocation10 + $0x120] sm:$0xff] %vm665_vm8, %v1623_v53 }
 0x3c1   :  { %1632 = vst.msk [vmem:[#allocation10 + $0x128] sm:$0xff] %vm665_vm8, %v1624_v30 }
 0x3c2   :  { %1633 = vst.msk [vmem:[#allocation10 + $0x130] sm:$0xff] %vm665_vm8, %v1625_v9 }
 0x3c3   :  { %1634 = vst.msk [vmem:[#allocation10 + $0x138] sm:$0xff] %vm665_vm8, %v1626_v25 }
 0x3cd   :  { %v1458_v3 = vpop.xlane.xlu0 %1457  ;;  %v1433_v40 = vpop.xlane.xlu2 %1432 }
 0x3ce   :  { %v1459_v52 = vrot.slane %v1458_v3, 4  ;;  %v1434_v58 = vrot.slane %v1433_v40, 4 }
 0x3d0   :  { %v1460_v1 = vmax.f32 %v1458_v3, %v1459_v52  ;;  %v1435_v60 = vmin.f32 %v1433_v40, %v1434_v58 }
 0x3d2   :  { %v1461_v47 = vrot.slane %v1460_v1, 2  ;;  %v1436_v55 = vrot.slane %v1435_v60, 2 }
 0x3d4   :  { %v1462_v56 = vmax.f32 %v1460_v1, %v1461_v47  ;;  %v1437_v2 = vmin.f32 %v1435_v60, %v1436_v55 }
 0x3d6   :  { %v1438_v61 = vrot.slane %v1437_v2, 1  ;;  %v1463_v32 = vrot.slane %v1462_v56, 1 }
 0x3d8   :  { %v1439_v6 = vmin.f32 %v1437_v2, %v1438_v61  ;;  %v1464_v10 = vmax.f32 %v1462_v56, %v1463_v32 }
 0x3da   :  { %1886 = vpush %v1439_v6 }
 0x3db   :  { %1888 = vpush %v1464_v10 }
 0x40b   :  { %s1887_s7 = spop %1886 }
 0x40c   :  { %v1441_v4 = vstv %s1887_s7  ;;  %s1889_s8 = spop %1888 }
 0x40d   :  { %v3106_v41 = vmin.f32 %v816_v59, %v1441_v4  ;;  %v1466_v46 = vstv %s1889_s8 }
 0x40e   :  { %v1636_v18 = vmax.f32 %v841_v31, %v1466_v46 }
 0x40f   :  { %v1663_v62 = vsub.f32 %v1655_v43, %v3106_v41  ;;  %v1664_v29 = vsub.f32 %v1656_v57, %v3106_v41  ;;  %v1665_v24 = vsub.f32 %v1657_v48, %v3106_v41  ;;  %v1666_v0 = vsub.f32 %v1658_v54, %v3106_v41 }
 0x410   :  { %v1637_v36 = vsub.f32 %v1636_v18, %v3106_v41  ;;  %v1667_v12 = vsub.f32 %v1659_v21, %v3106_v41  ;;  %v1668_v27 = vsub.f32 %v1660_v20, %v3106_v41  ;;  %v1669_v26 = vsub.f32 %v1661_v11, %v3106_v41 }
 0x411   :  { %v1670_v44 = vsub.f32 %v1662_v38, %v3106_v41  ;;  %v1695_v35 = vsub.f32 %v1687_v7, %v3106_v41  ;;  %v1696_v13 = vsub.f32 %v1688_v34, %v3106_v41  ;;  %v1697_v28 = vsub.f32 %v1689_v42, %v3106_v41 }
 0x412   :  { %v1638_v49 = vadd.f32 1e-08, %v1637_v36  ;;  %vm1653_vm7 = vcmp.lt.f32.partialorder %v1637_v36, 1e-08  ;;  %v1698_v53 = vsub.f32 %v1690_v19, %v3106_v41  ;;  %v1699_v22 = vsub.f32 %v1691_v8, %v3106_v41 }
 0x413   :  { %v1700_v9 = vsub.f32 %v1692_v63, %v3106_v41  ;;  %v1701_v25 = vsub.f32 %v1693_v16, %v3106_v41  ;;  %v1702_v3 = vsub.f32 %v1694_v14, %v3106_v41 }
 0x414   :  { %1940 = vrcp.f32 %v1638_v49  ;;  %v1650_v39 = vand.u32 2147483648, %v1638_v49  ;;  %v1648_v45 = vand.u32 2147483647, %v1638_v49  ;;  %vm1644_vm4 = vweird.f32 %v1638_v49 }
 0x416   :  { %v1651_v23 = vor.u32 1.1754944e-38, %v1650_v39  ;;  %vm1649_vm6 = vcmp.eq.f32.partialorder %v1648_v45, 8.507059e+37 }
 0x41a   :  { %v1941_v15 = vpop.eup %1940 }
 0x41b   :  { %v1640_v33 = vmul.f32 %v1941_v15, %v1638_v49  ;;  %vm1645_vm3 = vweird.f32 %v1941_v15 }
 0x41c   :  { %vm1646_vm5 = vmor %vm1644_vm4, %vm1645_vm3 }
 0x41d   :  { %v1641_v37 = vsub.f32 1.0, %v1640_v33 }
 0x41f   :  { %v1642_v17 = vmul.f32 %v1941_v15, %v1641_v37 }
 0x421   :  { %v1643_v5 = vadd.f32 %v1941_v15, %v1642_v17 }
 0x423   :  { %v1647_v51 = vsel %vm1646_vm5, %v1941_v15, %v1643_v5 }
 0x424   :  { %v1652_v50 = vsel %vm1649_vm6, %v1651_v23, %v1647_v51 }
 0x425   :  { %v1654_v30 = vsel %vm1653_vm7, 0.0, %v1652_v50 }
 0x426   :  { %v1671_v40 = vmul.f32 %v1663_v62, %v1654_v30  ;;  %v1672_v52 = vmul.f32 %v1664_v29, %v1654_v30  ;;  %v1673_v58 = vmul.f32 %v1665_v24, %v1654_v30  ;;  %v1674_v1 = vmul.f32 %v1666_v0, %v1654_v30 }
 0x427   :  { %v1675_v60 = vmul.f32 %v1667_v12, %v1654_v30  ;;  %v1676_v47 = vmul.f32 %v1668_v27, %v1654_v30  ;;  %v1677_v55 = vmul.f32 %v1669_v26, %v1654_v30  ;;  %v1678_v56 = vmul.f32 %v1670_v44, %v1654_v30 }
 0x428   :  { %1679 = vst.msk [vmem:[#allocation10 + $0x80] sm:$0xff] %vm665_vm8, %v1671_v40  ;;  %v1703_v2 = vmul.f32 %v1695_v35, %v1654_v30  ;;  %v1704_v61 = vmul.f32 %v1696_v13, %v1654_v30  ;;  %v1705_v32 = vmul.f32 %v1697_v28, %v1654_v30  ;;  %v1706_v6 = vmul.f32 %v1698_v53, %v1654_v30 }
 0x429   :  { %1680 = vst.msk [vmem:[#allocation10 + $0x88] sm:$0xff] %vm665_vm8, %v1672_v52  ;;  %v1707_v10 = vmul.f32 %v1699_v22, %v1654_v30  ;;  %v1708_v59 = vmul.f32 %v1700_v9, %v1654_v30  ;;  %v1709_v4 = vmul.f32 %v1701_v25, %v1654_v30  ;;  %v1710_v31 = vmul.f32 %v1702_v3, %v1654_v30 }
 0x42a   :  { %1681 = vst.msk [vmem:[#allocation10 + $0x90] sm:$0xff] %vm665_vm8, %v1673_v58 }
 0x42b   :  { %1682 = vst.msk [vmem:[#allocation10 + $0x98] sm:$0xff] %vm665_vm8, %v1674_v1 }
 0x42c   :  { %1683 = vst.msk [vmem:[#allocation10 + $0xa0] sm:$0xff] %vm665_vm8, %v1675_v60 }
 0x42d   :  { %1684 = vst.msk [vmem:[#allocation10 + $0xa8] sm:$0xff] %vm665_vm8, %v1676_v47 }
 0x42e   :  { %1685 = vst.msk [vmem:[#allocation10 + $0xb0] sm:$0xff] %vm665_vm8, %v1677_v55 }
 0x42f   :  { %1686 = vst.msk [vmem:[#allocation10 + $0xb8] sm:$0xff] %vm665_vm8, %v1678_v56 }
 0x430   :  { %1711 = vst.msk [vmem:[#allocation10 + $0x140] sm:$0xff] %vm665_vm8, %v1703_v2 }
 0x431   :  { %1712 = vst.msk [vmem:[#allocation10 + $0x148] sm:$0xff] %vm665_vm8, %v1704_v61 }
 0x432   :  { %1713 = vst.msk [vmem:[#allocation10 + $0x150] sm:$0xff] %vm665_vm8, %v1705_v32 }
 0x433   :  { %1714 = vst.msk [vmem:[#allocation10 + $0x158] sm:$0xff] %vm665_vm8, %v1706_v6 }
 0x434   :  { %1715 = vst.msk [vmem:[#allocation10 + $0x160] sm:$0xff] %vm665_vm8, %v1707_v10 }
 0x435   :  { %1716 = vst.msk [vmem:[#allocation10 + $0x168] sm:$0xff] %vm665_vm8, %v1708_v59 }
 0x436   :  { %1717 = vst.msk [vmem:[#allocation10 + $0x170] sm:$0xff] %vm665_vm8, %v1709_v4 }
 0x437   :  { %1718 = vst.msk [vmem:[#allocation10 + $0x178] sm:$0xff] %vm665_vm8, %v1710_v31 }
 0x438   :  { %1731 = dma.vmem_to_hbm [thread:$0]  %s1724_s9, 6144, %s1726_s1, [#allocation4], %s2071_s29, %s2071_s29, %s2072_s30  }
 0x439   :  { %2068 = dma.done.wait [#allocation4], 6144  }
 0x43a   :  { %2069 = vsyncadd [#allocation4], 4294961152 }
 0x43b   :  { %1736 = vsyncpa [#allocation3], 1 }
 0x43c   :  { %1737 = vsyncpa [#allocation6], 1 }
 0x43d   :  { %1738 = vsyncpa [#allocation9], 1 }
 0x43e   :  { %1739 = vsyncpa [#allocation4], 1 }

</bundles_post_ra>
